<compile_context>
chip_gen: v7x
topology: tpu7x:2x2x1
jax: 0.10.0
libtpu: 0.0.40
codegen_flags: <defaults>
</compile_context>

<pallas_src>
import jax
import jax.numpy as jnp
from jax import lax
from jax.experimental import pallas as pl
from jax.experimental.pallas import tpu as pltpu  # noqa: F401  (kept for real-model CompilerParams)

# ------------------------- small, module-consistent config -------------------
B = 2                       # batch
N_Q = 8                     # number of img_queries          (real model: 128)
D = 128                     # hidden dim ("self.dim")         (real model: 768)
HEADS = 4                   # attention heads                 (real model: 8)
DIM_HEAD = 32               # per-head dim                    (real model: 64)
PH = 128                    # per-head width padded to one lane tile
C = 128                     # img_hidden_sz (context dim)
M = 8                       # number of image feature tokens  (real model: 15*15)
VOCAB = 16                  # word-embedding vocab (only the [SEP] row is used)
SEP_ID = 3                  # args.vocab.stoi['[SEP]']
N_TT = 2                    # token-type vocab (BERT type_vocab_size == 2)
S = N_Q + 1                 # output sequence length ([SEP] + pooled image tokens)

EPS_COCA = 1e-5             # F.layer_norm default (CrossAttention / pool norms)
EPS_BERT = 1e-12            # BERT embeddings LayerNorm


# ------------------------------ layer norms -----------------------------------
def _ln_core(x, eps):
    mu = jnp.mean(x, axis=-1, keepdims=True)
    var = jnp.mean(jnp.square(x - mu), axis=-1, keepdims=True)
    return (x - mu) * lax.rsqrt(var + eps)


def _layer_norm_g(x, gamma, eps):
    # beta == 0 specialization (q_norm / ctx_norm / pool_norm).
    return _ln_core(x, eps) * gamma


def _layer_norm(x, gamma, beta, eps):
    return _ln_core(x, eps) * gamma + beta


# ----------------------------- Pallas kernel ---------------------------------
def image_bert_emb_kernel(
    imgs_ref,         # (B, M, C)          image features
    ids_ref,          # (B, S, 1) int32    token-type ids
    queries_ref,      # (N_Q, D)           learnable img_queries (shared over batch)
    q_norm_g_ref,     # (1, D)             CrossAttention.norm gamma (beta == 0)
    ctx_norm_g_ref,   # (1, C)             CrossAttention.context_norm gamma
    wq_ref,           # (D, HEADS*PH)      to_q, scale folded in, heads padded to 128 lanes
    wk_ref,           # (C, PH)            K half of to_kv, padded to 128 lanes
    wv_ref,           # (C, PH)            V half of to_kv, padded to 128 lanes
    wout_ref,         # (HEADS*PH, D)      to_out, padded rows for the head padding
    pool_norm_g_ref,  # (1, D)             img_attn_pool_norm gamma
    tt_table_ref,     # (N_TT, D)          token_type_embeddings table
    sep_ref,          # (1, D)             [SEP] word-embedding row
    ln_g_ref,         # (1, D)             BERT LayerNorm gamma
    ln_b_ref,         # (1, D)             BERT LayerNorm beta
    out_ref,          # (B, S, D)
):
    f32 = jnp.float32

    # --- loop-invariant loads (hoisted out of the static batch loop) ---------
    ctx_norm_g = ctx_norm_g_ref[...]
    wk = wk_ref[...]
    wv = wv_ref[...]
    wout = wout_ref[...]
    pool_norm_g = pool_norm_g_ref[...]
    sep = sep_ref[...]                                                   # (1, D)
    ln_g = ln_g_ref[...]
    ln_b = ln_b_ref[...]
    tt0 = tt_table_ref[0:1, :]                                           # (1, D)
    tt1 = tt_table_ref[1:2, :]                                           # (1, D)  (N_TT == 2)

    # --- CrossAttention query path (batch-invariant, computed once) ----------
    xn = _layer_norm_g(queries_ref[...], q_norm_g_ref[...], EPS_COCA)    # (N_Q, D)
    q = jnp.dot(xn, wq_ref[...], preferred_element_type=f32)             # (N_Q, HEADS*PH)
    # Heads stacked along sublanes; each head occupies a full 128-lane tile,
    # so this row-major reshape is a tile-aligned regrouping.
    q2 = q.reshape(N_Q * HEADS, PH)                                      # (N_Q*H, PH)

    for b in range(B):  # static unroll; B is tiny
        # --- context path: per-batch LN + separate K / V projections ---------
        cn_b = _layer_norm_g(imgs_ref[b], ctx_norm_g, EPS_COCA)          # (M, C)
        k_b = jnp.dot(cn_b, wk, preferred_element_type=f32)              # (M, PH)
        v_b = jnp.dot(cn_b, wv, preferred_element_type=f32)              # (M, PH)

        # All heads at once; contract padded head dim of q2 against k_b
        # (no explicit k.T).  Zero pad lanes contribute nothing.
        sim = lax.dot_general(q2, k_b, (((1,), (1,)), ((), ())),
                              preferred_element_type=f32)                # (N_Q*H, M)
        sim = sim - jnp.max(sim, axis=-1, keepdims=True)
        p = jnp.exp(sim)
        attn = p / jnp.sum(p, axis=-1, keepdims=True)                    # exact divide
        ho = jnp.dot(attn, v_b, preferred_element_type=f32)              # (N_Q*H, PH)

        # Head concat folded back into the Wout contraction (tile-aligned
        # inverse reshape; padded rows of wout are zero).
        attn_out = ho.reshape(N_Q, HEADS * PH)
        pooled = jnp.dot(attn_out, wout, preferred_element_type=f32)     # (N_Q, D)
        pooled = _layer_norm_g(pooled, pool_norm_g, EPS_COCA)

        # --- token-type embeddings via VPU select (N_TT == 2, gather-free) ---
        tt_b = jnp.where(ids_ref[b] == 0, tt0, tt1)                      # (S, D)

        # --- [SEP] + pooled slab, one BERT LayerNorm, one aligned store -------
        token_emb = jnp.concatenate([sep, pooled], axis=0)               # (S, D)
        slab = _layer_norm(token_emb + tt_b, ln_g, ln_b, EPS_BERT)
        # TODO(synk): self.dropout is stochastic in training mode; here it is
        # the inference identity.
        out_ref[b] = slab


def image_bert_embeddings(input_imgs, token_type_ids, kparams):
    """Single pallas_call, no grid: the whole (tiny) working set lives in VMEM.

    For the real model on v7x, use grid=(B,) with
    compiler_params=pltpu.CompilerParams(dimension_semantics=("parallel",)) to
    put one batch element on each TensorCore; keep the collapsed form on
    v5e/v6e.
    """
    ids3 = token_type_ids.astype(jnp.int32).reshape(B, S, 1)
    return pl.pallas_call(
        image_bert_emb_kernel,
        out_shape=jax.ShapeDtypeStruct((B, S, D), jnp.float32),
    )(
        input_imgs,
        ids3,
        kparams["img_queries"],
        kparams["q_norm_gamma"],
        kparams["ctx_norm_gamma"],
        kparams["wq_pad"],
        kparams["wk_pad"],
        kparams["wv_pad"],
        kparams["wout_pad"],
        kparams["pool_norm_gamma"],
        kparams["token_type_emb"],
        kparams["sep_embed"],
        kparams["ln_gamma"],
        kparams["ln_beta"],
    )


def build_kernel_params(params):
    """One-time host-side derived parameters (constant folds, not per-call ops).

      * DIM_HEAD**-0.5 folded into Wq,
      * per-head widths zero-padded to 128 lanes so the in-kernel head
        split/merge reshapes are lane-tile aligned,
      * to_kv split into separate K / V matrices (no in-kernel lane slices),
      * only the [SEP] row of the word-embedding table handed to the kernel.
    """
    kparams = dict(params)
    wq_scaled = params["wq"] * (DIM_HEAD ** -0.5)                        # (D, H*dh)
    kparams["wq_pad"] = jnp.pad(
        wq_scaled.reshape(D, HEADS, DIM_HEAD),
        ((0, 0), (0, 0), (0, PH - DIM_HEAD))).reshape(D, HEADS * PH)
    kparams["wout_pad"] = jnp.pad(
        params["wout"].reshape(HEADS, DIM_HEAD, D),
        ((0, 0), (0, PH - DIM_HEAD), (0, 0))).reshape(HEADS * PH, D)
    kparams["wk_pad"] = jnp.pad(params["wkv"][:, :DIM_HEAD],
                                ((0, 0), (0, PH - DIM_HEAD)))
    kparams["wv_pad"] = jnp.pad(params["wkv"][:, DIM_HEAD:],
                                ((0, 0), (0, PH - DIM_HEAD)))
    kparams["sep_embed"] = params["word_emb"][SEP_ID][None, :]
    return kparams


# ------------------------- pure-JAX reference (validation) -------------------
def reference(input_imgs, token_type_ids, params):
    sep_embed = params["word_emb"][SEP_ID][None, None, :]
    sep_embed = jnp.broadcast_to(sep_embed, (B, 1, D))
    tt_embeds = params["token_type_emb"][token_type_ids]                 # (B, S, D)

    queries = jnp.broadcast_to(params["img_queries"][None], (B, N_Q, D))
    xn = _layer_norm_g(queries, params["q_norm_gamma"], EPS_COCA)
    cn = _layer_norm_g(input_imgs, params["ctx_norm_gamma"], EPS_COCA)

    q = jnp.einsum("bnd,de->bne", xn, params["wq"]) * (DIM_HEAD ** -0.5)
    q = q.reshape(B, N_Q, HEADS, DIM_HEAD).transpose(0, 2, 1, 3)         # (B,H,N,dh)
    kv = jnp.einsum("bmc,ce->bme", cn, params["wkv"])
    k, v = kv[..., :DIM_HEAD], kv[..., DIM_HEAD:]

    sim = jnp.einsum("bhnd,bmd->bhnm", q, k)
    sim = sim - jnp.max(sim, axis=-1, keepdims=True)
    attn = jnp.exp(sim)
    attn = attn / jnp.sum(attn, axis=-1, keepdims=True)
    out = jnp.einsum("bhnm,bmd->bhnd", attn, v)
    out = out.transpose(0, 2, 1, 3).reshape(B, N_Q, HEADS * DIM_HEAD)
    out = jnp.einsum("bne,ed->bnd", out, params["wout"])
    pooled = _layer_norm_g(out, params["pool_norm_gamma"], EPS_COCA)

    token_emb = jnp.concatenate([sep_embed, pooled], axis=1)
    emb = token_emb + tt_embeds
    return _layer_norm(emb, params["ln_gamma"], params["ln_beta"], EPS_BERT)


# ----------------------------------- main -------------------------------------
if __name__ == "__main__":
    key = jax.random.PRNGKey(0)
    ks = jax.random.split(key, 12)

    params = {
        "img_queries":     jax.random.normal(ks[0], (N_Q, D), jnp.float32),
        "q_norm_gamma":    jnp.ones((1, D), jnp.float32) + 0.05 * jax.random.normal(ks[1], (1, D)),
        "ctx_norm_gamma":  jnp.ones((1, C), jnp.float32) + 0.05 * jax.random.normal(ks[2], (1, C)),
        "wq":              0.1 * jax.random.normal(ks[3], (D, HEADS * DIM_HEAD), jnp.float32),
        "wkv":             0.1 * jax.random.normal(ks[4], (C, 2 * DIM_HEAD), jnp.float32),
        "wout":            0.1 * jax.random.normal(ks[5], (HEADS * DIM_HEAD, D), jnp.float32),
        "pool_norm_gamma": jnp.ones((1, D), jnp.float32) + 0.05 * jax.random.normal(ks[6], (1, D)),
        "word_emb":        0.1 * jax.random.normal(ks[7], (VOCAB, D), jnp.float32),
        "token_type_emb":  0.1 * jax.random.normal(ks[8], (N_TT, D), jnp.float32),
        "ln_gamma":        jnp.ones((1, D), jnp.float32) + 0.05 * jax.random.normal(ks[9], (1, D)),
        "ln_beta":         0.05 * jax.random.normal(ks[10], (1, D), jnp.float32),
    }
    kparams = build_kernel_params(params)

    input_imgs = jax.random.normal(ks[11], (B, M, C), jnp.float32)
    # The module fills the image-segment token-type ids with zeros (img_tok).
    token_type_ids = jnp.zeros((B, S), jnp.int32)

    out = image_bert_embeddings(input_imgs, token_type_ids, kparams)
    out = jax.block_until_ready(out)

    ref = reference(input_imgs, token_type_ids, params)
    assert out.shape == (B, S, D), out.shape
    err = float(jnp.max(jnp.abs(out - ref)))
    assert err < 1e-3, err

    print("KERNEL_OK")
</pallas_src>

<mosaic_0001>
module attributes {stable_mosaic.version = 11 : i64} {
  func.func @image_bert_emb_kernel(%arg0: memref<2x8x128xf32, #tpu.memory_space<vmem>>, %arg1: memref<2x9x1xi32, #tpu.memory_space<vmem>>, %arg2: memref<8x128xf32, #tpu.memory_space<vmem>>, %arg3: memref<1x128xf32, #tpu.memory_space<vmem>>, %arg4: memref<1x128xf32, #tpu.memory_space<vmem>>, %arg5: memref<128x512xf32, #tpu.memory_space<vmem>>, %arg6: memref<128x128xf32, #tpu.memory_space<vmem>>, %arg7: memref<128x128xf32, #tpu.memory_space<vmem>>, %arg8: memref<512x128xf32, #tpu.memory_space<vmem>>, %arg9: memref<1x128xf32, #tpu.memory_space<vmem>>, %arg10: memref<2x128xf32, #tpu.memory_space<vmem>>, %arg11: memref<1x128xf32, #tpu.memory_space<vmem>>, %arg12: memref<1x128xf32, #tpu.memory_space<vmem>>, %arg13: memref<1x128xf32, #tpu.memory_space<vmem>>, %arg14: memref<2x9x128xf32, #tpu.memory_space<vmem>>) attributes {dimension_semantics = [], scalar_prefetch = 0 : i64, scratch_operands = 0 : i64, tpu.core_type = #tpu.core_type<tc>} {
    %c0 = arith.constant 0 : index
    %c0_0 = arith.constant 0 : index
    %0 = vector.load %arg4[%c0, %c0_0] : memref<1x128xf32, #tpu.memory_space<vmem>>, vector<1x128xf32>
    %c0_1 = arith.constant 0 : index
    %c0_2 = arith.constant 0 : index
    %1 = vector.load %arg6[%c0_1, %c0_2] : memref<128x128xf32, #tpu.memory_space<vmem>>, vector<128x128xf32>
    %c0_3 = arith.constant 0 : index
    %c0_4 = arith.constant 0 : index
    %2 = vector.load %arg7[%c0_3, %c0_4] : memref<128x128xf32, #tpu.memory_space<vmem>>, vector<128x128xf32>
    %c0_5 = arith.constant 0 : index
    %c0_6 = arith.constant 0 : index
    %3 = vector.load %arg8[%c0_5, %c0_6] : memref<512x128xf32, #tpu.memory_space<vmem>>, vector<512x128xf32>
    %c0_7 = arith.constant 0 : index
    %c0_8 = arith.constant 0 : index
    %4 = vector.load %arg9[%c0_7, %c0_8] : memref<1x128xf32, #tpu.memory_space<vmem>>, vector<1x128xf32>
    %c0_9 = arith.constant 0 : index
    %c0_10 = arith.constant 0 : index
    %5 = vector.load %arg11[%c0_9, %c0_10] : memref<1x128xf32, #tpu.memory_space<vmem>>, vector<1x128xf32>
    %c0_11 = arith.constant 0 : index
    %c0_12 = arith.constant 0 : index
    %6 = vector.load %arg12[%c0_11, %c0_12] : memref<1x128xf32, #tpu.memory_space<vmem>>, vector<1x128xf32>
    %c0_13 = arith.constant 0 : index
    %c0_14 = arith.constant 0 : index
    %7 = vector.load %arg13[%c0_13, %c0_14] : memref<1x128xf32, #tpu.memory_space<vmem>>, vector<1x128xf32>
    %c0_15 = arith.constant 0 : index
    %c0_16 = arith.constant 0 : index
    %8 = vector.load %arg10[%c0_15, %c0_16] : memref<2x128xf32, #tpu.memory_space<vmem>>, vector<1x128xf32>
    %c1 = arith.constant 1 : index
    %c0_17 = arith.constant 0 : index
    %9 = vector.load %arg10[%c1, %c0_17] : memref<2x128xf32, #tpu.memory_space<vmem>>, vector<1x128xf32>
    %c0_18 = arith.constant 0 : index
    %c0_19 = arith.constant 0 : index
    %10 = vector.load %arg2[%c0_18, %c0_19] : memref<8x128xf32, #tpu.memory_space<vmem>>, vector<8x128xf32>
    %c0_20 = arith.constant 0 : index
    %c0_21 = arith.constant 0 : index
    %11 = vector.load %arg3[%c0_20, %c0_21] : memref<1x128xf32, #tpu.memory_space<vmem>>, vector<1x128xf32>
    %cst = arith.constant dense<0.000000e+00> : vector<8xf32>
    %12 = vector.multi_reduction <add>, %10, %cst [1] : vector<8x128xf32> to vector<8xf32>
    %13 = vector.shape_cast %12 : vector<8xf32> to vector<8x1xf32>
    %cst_22 = arith.constant 1.280000e+02 : f32
    %14 = vector.broadcast %cst_22 : f32 to vector<8x1xf32>
    %15 = arith.divf %13, %14 : vector<8x1xf32>
    %16 = vector.broadcast %15 : vector<8x1xf32> to vector<8x128xf32>
    %17 = arith.subf %10, %16 : vector<8x128xf32>
    %18 = arith.mulf %17, %17 : vector<8x128xf32>
    %cst_23 = arith.constant dense<0.000000e+00> : vector<8xf32>
    %19 = vector.multi_reduction <add>, %18, %cst_23 [1] : vector<8x128xf32> to vector<8xf32>
    %20 = vector.shape_cast %19 : vector<8xf32> to vector<8x1xf32>
    %cst_24 = arith.constant 1.280000e+02 : f32
    %21 = vector.broadcast %cst_24 : f32 to vector<8x1xf32>
    %22 = arith.divf %20, %21 : vector<8x1xf32>
    %23 = vector.broadcast %15 : vector<8x1xf32> to vector<8x128xf32>
    %24 = arith.subf %10, %23 : vector<8x128xf32>
    %cst_25 = arith.constant 9.99999974E-6 : f32
    %25 = vector.broadcast %cst_25 : f32 to vector<8x1xf32>
    %26 = arith.addf %22, %25 : vector<8x1xf32>
    %27 = math.rsqrt %26 : vector<8x1xf32>
    %28 = vector.broadcast %27 : vector<8x1xf32> to vector<8x128xf32>
    %29 = arith.mulf %24, %28 : vector<8x128xf32>
    %30 = vector.broadcast %11 : vector<1x128xf32> to vector<8x128xf32>
    %31 = arith.mulf %29, %30 : vector<8x128xf32>
    %c0_26 = arith.constant 0 : index
    %c0_27 = arith.constant 0 : index
    %32 = vector.load %arg5[%c0_26, %c0_27] : memref<128x512xf32, #tpu.memory_space<vmem>>, vector<128x512xf32>
    %cst_28 = arith.constant dense<0.000000e+00> : vector<8x512xf32>
    %33 = tpu.matmul %31, %32, %cst_28 {dimension_numbers = #tpu.dot_dimension_numbers<[1], [0], [0], [1], [0, 0, 1, 1], [], []>} : vector<8x128xf32>, vector<128x512xf32>, vector<8x512xf32> -> vector<8x512xf32>
    %34 = vector.shape_cast %33 : vector<8x512xf32> to vector<32x128xf32>
    %c0_29 = arith.constant 0 : index
    %c0_30 = arith.constant 0 : index
    %c0_31 = arith.constant 0 : index
    %35 = vector.load %arg0[%c0_29, %c0_30, %c0_31] : memref<2x8x128xf32, #tpu.memory_space<vmem>>, vector<1x8x128xf32>
    %36 = vector.shape_cast %35 : vector<1x8x128xf32> to vector<8x128xf32>
    %cst_32 = arith.constant dense<0.000000e+00> : vector<8xf32>
    %37 = vector.multi_reduction <add>, %36, %cst_32 [1] : vector<8x128xf32> to vector<8xf32>
    %38 = vector.shape_cast %37 : vector<8xf32> to vector<8x1xf32>
    %cst_33 = arith.constant 1.280000e+02 : f32
    %39 = vector.broadcast %cst_33 : f32 to vector<8x1xf32>
    %40 = arith.divf %38, %39 : vector<8x1xf32>
    %41 = vector.broadcast %40 : vector<8x1xf32> to vector<8x128xf32>
    %42 = arith.subf %36, %41 : vector<8x128xf32>
    %43 = arith.mulf %42, %42 : vector<8x128xf32>
    %cst_34 = arith.constant dense<0.000000e+00> : vector<8xf32>
    %44 = vector.multi_reduction <add>, %43, %cst_34 [1] : vector<8x128xf32> to vector<8xf32>
    %45 = vector.shape_cast %44 : vector<8xf32> to vector<8x1xf32>
    %cst_35 = arith.constant 1.280000e+02 : f32
    %46 = vector.broadcast %cst_35 : f32 to vector<8x1xf32>
    %47 = arith.divf %45, %46 : vector<8x1xf32>
    %48 = vector.broadcast %40 : vector<8x1xf32> to vector<8x128xf32>
    %49 = arith.subf %36, %48 : vector<8x128xf32>
    %cst_36 = arith.constant 9.99999974E-6 : f32
    %50 = vector.broadcast %cst_36 : f32 to vector<8x1xf32>
    %51 = arith.addf %47, %50 : vector<8x1xf32>
    %52 = math.rsqrt %51 : vector<8x1xf32>
    %53 = vector.broadcast %52 : vector<8x1xf32> to vector<8x128xf32>
    %54 = arith.mulf %49, %53 : vector<8x128xf32>
    %55 = vector.broadcast %0 : vector<1x128xf32> to vector<8x128xf32>
    %56 = arith.mulf %54, %55 : vector<8x128xf32>
    %cst_37 = arith.constant dense<0.000000e+00> : vector<8x128xf32>
    %57 = tpu.matmul %56, %1, %cst_37 {dimension_numbers = #tpu.dot_dimension_numbers<[1], [0], [0], [1], [0, 0, 1, 1], [], []>} : vector<8x128xf32>, vector<128x128xf32>, vector<8x128xf32> -> vector<8x128xf32>
    %cst_38 = arith.constant dense<0.000000e+00> : vector<8x128xf32>
    %58 = tpu.matmul %56, %2, %cst_38 {dimension_numbers = #tpu.dot_dimension_numbers<[1], [0], [0], [1], [0, 0, 1, 1], [], []>} : vector<8x128xf32>, vector<128x128xf32>, vector<8x128xf32> -> vector<8x128xf32>
    %cst_39 = arith.constant dense<0.000000e+00> : vector<32x8xf32>
    %59 = tpu.matmul %34, %57, %cst_39 {dimension_numbers = #tpu.dot_dimension_numbers<[1], [1], [0], [0], [0, 0, 1, 0], [], []>} : vector<32x128xf32>, vector<8x128xf32>, vector<32x8xf32> -> vector<32x8xf32>
    %cst_40 = arith.constant dense<0xFF800000> : vector<32xf32>
    %60 = vector.multi_reduction <maximumf>, %59, %cst_40 [1] : vector<32x8xf32> to vector<32xf32>
    %61 = vector.shape_cast %60 : vector<32xf32> to vector<32x1xf32>
    %62 = vector.broadcast %61 : vector<32x1xf32> to vector<32x8xf32>
    %63 = arith.subf %59, %62 : vector<32x8xf32>
    %64 = math.exp %63 : vector<32x8xf32>
    %cst_41 = arith.constant dense<0.000000e+00> : vector<32xf32>
    %65 = vector.multi_reduction <add>, %64, %cst_41 [1] : vector<32x8xf32> to vector<32xf32>
    %66 = vector.shape_cast %65 : vector<32xf32> to vector<32x1xf32>
    %67 = vector.broadcast %66 : vector<32x1xf32> to vector<32x8xf32>
    %68 = arith.divf %64, %67 : vector<32x8xf32>
    %cst_42 = arith.constant dense<0.000000e+00> : vector<32x128xf32>
    %69 = tpu.matmul %68, %58, %cst_42 {dimension_numbers = #tpu.dot_dimension_numbers<[1], [0], [0], [1], [0, 0, 1, 1], [], []>} : vector<32x8xf32>, vector<8x128xf32>, vector<32x128xf32> -> vector<32x128xf32>
    %70 = vector.shape_cast %69 : vector<32x128xf32> to vector<8x512xf32>
    %cst_43 = arith.constant dense<0.000000e+00> : vector<8x128xf32>
    %71 = tpu.matmul %70, %3, %cst_43 {dimension_numbers = #tpu.dot_dimension_numbers<[1], [0], [0], [1], [0, 0, 1, 1], [], []>} : vector<8x512xf32>, vector<512x128xf32>, vector<8x128xf32> -> vector<8x128xf32>
    %cst_44 = arith.constant dense<0.000000e+00> : vector<8xf32>
    %72 = vector.multi_reduction <add>, %71, %cst_44 [1] : vector<8x128xf32> to vector<8xf32>
    %73 = vector.shape_cast %72 : vector<8xf32> to vector<8x1xf32>
    %cst_45 = arith.constant 1.280000e+02 : f32
    %74 = vector.broadcast %cst_45 : f32 to vector<8x1xf32>
    %75 = arith.divf %73, %74 : vector<8x1xf32>
    %76 = vector.broadcast %75 : vector<8x1xf32> to vector<8x128xf32>
    %77 = arith.subf %71, %76 : vector<8x128xf32>
    %78 = arith.mulf %77, %77 : vector<8x128xf32>
    %cst_46 = arith.constant dense<0.000000e+00> : vector<8xf32>
    %79 = vector.multi_reduction <add>, %78, %cst_46 [1] : vector<8x128xf32> to vector<8xf32>
    %80 = vector.shape_cast %79 : vector<8xf32> to vector<8x1xf32>
    %cst_47 = arith.constant 1.280000e+02 : f32
    %81 = vector.broadcast %cst_47 : f32 to vector<8x1xf32>
    %82 = arith.divf %80, %81 : vector<8x1xf32>
    %83 = vector.broadcast %75 : vector<8x1xf32> to vector<8x128xf32>
    %84 = arith.subf %71, %83 : vector<8x128xf32>
    %cst_48 = arith.constant 9.99999974E-6 : f32
    %85 = vector.broadcast %cst_48 : f32 to vector<8x1xf32>
    %86 = arith.addf %82, %85 : vector<8x1xf32>
    %87 = math.rsqrt %86 : vector<8x1xf32>
    %88 = vector.broadcast %87 : vector<8x1xf32> to vector<8x128xf32>
    %89 = arith.mulf %84, %88 : vector<8x128xf32>
    %90 = vector.broadcast %4 : vector<1x128xf32> to vector<8x128xf32>
    %91 = arith.mulf %89, %90 : vector<8x128xf32>
    %c0_49 = arith.constant 0 : index
    %c0_50 = arith.constant 0 : index
    %c0_51 = arith.constant 0 : index
    %92 = vector.load %arg1[%c0_49, %c0_50, %c0_51] : memref<2x9x1xi32, #tpu.memory_space<vmem>>, vector<1x9x1xi32>
    %93 = vector.shape_cast %92 : vector<1x9x1xi32> to vector<9x1xi32>
    %c0_i32 = arith.constant 0 : i32
    %94 = vector.broadcast %c0_i32 : i32 to vector<9x1xi32>
    %95 = arith.cmpi eq, %93, %94 : vector<9x1xi32>
    %96 = vector.shape_cast %95 : vector<9x1xi1> to vector<9x1xi1>
    %97 = vector.broadcast %96 : vector<9x1xi1> to vector<9x128xi1>
    %98 = vector.shape_cast %8 : vector<1x128xf32> to vector<1x128xf32>
    %99 = vector.broadcast %98 : vector<1x128xf32> to vector<9x128xf32>
    %100 = vector.shape_cast %9 : vector<1x128xf32> to vector<1x128xf32>
    %101 = vector.broadcast %100 : vector<1x128xf32> to vector<9x128xf32>
    %102 = arith.select %97, %99, %101 : vector<9x128xi1>, vector<9x128xf32>
    %103 = tpu.concatenate %5, %91 in 0 : vector<1x128xf32>, vector<8x128xf32> -> vector<9x128xf32>
    %104 = arith.addf %103, %102 : vector<9x128xf32>
    %cst_52 = arith.constant dense<0.000000e+00> : vector<9xf32>
    %105 = vector.multi_reduction <add>, %104, %cst_52 [1] : vector<9x128xf32> to vector<9xf32>
    %106 = vector.shape_cast %105 : vector<9xf32> to vector<9x1xf32>
    %cst_53 = arith.constant 1.280000e+02 : f32
    %107 = vector.broadcast %cst_53 : f32 to vector<9x1xf32>
    %108 = arith.divf %106, %107 : vector<9x1xf32>
    %109 = vector.broadcast %108 : vector<9x1xf32> to vector<9x128xf32>
    %110 = arith.subf %104, %109 : vector<9x128xf32>
    %111 = arith.mulf %110, %110 : vector<9x128xf32>
    %cst_54 = arith.constant dense<0.000000e+00> : vector<9xf32>
    %112 = vector.multi_reduction <add>, %111, %cst_54 [1] : vector<9x128xf32> to vector<9xf32>
    %113 = vector.shape_cast %112 : vector<9xf32> to vector<9x1xf32>
    %cst_55 = arith.constant 1.280000e+02 : f32
    %114 = vector.broadcast %cst_55 : f32 to vector<9x1xf32>
    %115 = arith.divf %113, %114 : vector<9x1xf32>
    %116 = vector.broadcast %108 : vector<9x1xf32> to vector<9x128xf32>
    %117 = arith.subf %104, %116 : vector<9x128xf32>
    %cst_56 = arith.constant 9.99999996E-13 : f32
    %118 = vector.broadcast %cst_56 : f32 to vector<9x1xf32>
    %119 = arith.addf %115, %118 : vector<9x1xf32>
    %120 = math.rsqrt %119 : vector<9x1xf32>
    %121 = vector.broadcast %120 : vector<9x1xf32> to vector<9x128xf32>
    %122 = arith.mulf %117, %121 : vector<9x128xf32>
    %123 = vector.broadcast %6 : vector<1x128xf32> to vector<9x128xf32>
    %124 = arith.mulf %122, %123 : vector<9x128xf32>
    %125 = vector.broadcast %7 : vector<1x128xf32> to vector<9x128xf32>
    %126 = arith.addf %124, %125 : vector<9x128xf32>
    %c0_57 = arith.constant 0 : index
    %c0_58 = arith.constant 0 : index
    %c0_59 = arith.constant 0 : index
    %127 = vector.load %arg14[%c0_57, %c0_58, %c0_59] : memref<2x9x128xf32, #tpu.memory_space<vmem>>, vector<1x9x128xf32>
    %128 = vector.shape_cast %127 : vector<1x9x128xf32> to vector<9x128xf32>
    %129 = vector.shape_cast %126 : vector<9x128xf32> to vector<1x9x128xf32>
    tpu.vector_store %arg14[%c0_57, %c0_58, %c0_59], %129 {strides = array<i32>} : memref<2x9x128xf32, #tpu.memory_space<vmem>>, vector<1x9x128xf32>,
    %c1_60 = arith.constant 1 : index
    %c0_61 = arith.constant 0 : index
    %c0_62 = arith.constant 0 : index
    %130 = vector.load %arg0[%c1_60, %c0_61, %c0_62] : memref<2x8x128xf32, #tpu.memory_space<vmem>>, vector<1x8x128xf32>
    %131 = vector.shape_cast %130 : vector<1x8x128xf32> to vector<8x128xf32>
    %cst_63 = arith.constant dense<0.000000e+00> : vector<8xf32>
    %132 = vector.multi_reduction <add>, %131, %cst_63 [1] : vector<8x128xf32> to vector<8xf32>
    %133 = vector.shape_cast %132 : vector<8xf32> to vector<8x1xf32>
    %cst_64 = arith.constant 1.280000e+02 : f32
    %134 = vector.broadcast %cst_64 : f32 to vector<8x1xf32>
    %135 = arith.divf %133, %134 : vector<8x1xf32>
    %136 = vector.broadcast %135 : vector<8x1xf32> to vector<8x128xf32>
    %137 = arith.subf %131, %136 : vector<8x128xf32>
    %138 = arith.mulf %137, %137 : vector<8x128xf32>
    %cst_65 = arith.constant dense<0.000000e+00> : vector<8xf32>
    %139 = vector.multi_reduction <add>, %138, %cst_65 [1] : vector<8x128xf32> to vector<8xf32>
    %140 = vector.shape_cast %139 : vector<8xf32> to vector<8x1xf32>
    %cst_66 = arith.constant 1.280000e+02 : f32
    %141 = vector.broadcast %cst_66 : f32 to vector<8x1xf32>
    %142 = arith.divf %140, %141 : vector<8x1xf32>
    %143 = vector.broadcast %135 : vector<8x1xf32> to vector<8x128xf32>
    %144 = arith.subf %131, %143 : vector<8x128xf32>
    %cst_67 = arith.constant 9.99999974E-6 : f32
    %145 = vector.broadcast %cst_67 : f32 to vector<8x1xf32>
    %146 = arith.addf %142, %145 : vector<8x1xf32>
    %147 = math.rsqrt %146 : vector<8x1xf32>
    %148 = vector.broadcast %147 : vector<8x1xf32> to vector<8x128xf32>
    %149 = arith.mulf %144, %148 : vector<8x128xf32>
    %150 = vector.broadcast %0 : vector<1x128xf32> to vector<8x128xf32>
    %151 = arith.mulf %149, %150 : vector<8x128xf32>
    %cst_68 = arith.constant dense<0.000000e+00> : vector<8x128xf32>
    %152 = tpu.matmul %151, %1, %cst_68 {dimension_numbers = #tpu.dot_dimension_numbers<[1], [0], [0], [1], [0, 0, 1, 1], [], []>} : vector<8x128xf32>, vector<128x128xf32>, vector<8x128xf32> -> vector<8x128xf32>
    %cst_69 = arith.constant dense<0.000000e+00> : vector<8x128xf32>
    %153 = tpu.matmul %151, %2, %cst_69 {dimension_numbers = #tpu.dot_dimension_numbers<[1], [0], [0], [1], [0, 0, 1, 1], [], []>} : vector<8x128xf32>, vector<128x128xf32>, vector<8x128xf32> -> vector<8x128xf32>
    %cst_70 = arith.constant dense<0.000000e+00> : vector<32x8xf32>
    %154 = tpu.matmul %34, %152, %cst_70 {dimension_numbers = #tpu.dot_dimension_numbers<[1], [1], [0], [0], [0, 0, 1, 0], [], []>} : vector<32x128xf32>, vector<8x128xf32>, vector<32x8xf32> -> vector<32x8xf32>
    %cst_71 = arith.constant dense<0xFF800000> : vector<32xf32>
    %155 = vector.multi_reduction <maximumf>, %154, %cst_71 [1] : vector<32x8xf32> to vector<32xf32>
    %156 = vector.shape_cast %155 : vector<32xf32> to vector<32x1xf32>
    %157 = vector.broadcast %156 : vector<32x1xf32> to vector<32x8xf32>
    %158 = arith.subf %154, %157 : vector<32x8xf32>
    %159 = math.exp %158 : vector<32x8xf32>
    %cst_72 = arith.constant dense<0.000000e+00> : vector<32xf32>
    %160 = vector.multi_reduction <add>, %159, %cst_72 [1] : vector<32x8xf32> to vector<32xf32>
    %161 = vector.shape_cast %160 : vector<32xf32> to vector<32x1xf32>
    %162 = vector.broadcast %161 : vector<32x1xf32> to vector<32x8xf32>
    %163 = arith.divf %159, %162 : vector<32x8xf32>
    %cst_73 = arith.constant dense<0.000000e+00> : vector<32x128xf32>
    %164 = tpu.matmul %163, %153, %cst_73 {dimension_numbers = #tpu.dot_dimension_numbers<[1], [0], [0], [1], [0, 0, 1, 1], [], []>} : vector<32x8xf32>, vector<8x128xf32>, vector<32x128xf32> -> vector<32x128xf32>
    %165 = vector.shape_cast %164 : vector<32x128xf32> to vector<8x512xf32>
    %cst_74 = arith.constant dense<0.000000e+00> : vector<8x128xf32>
    %166 = tpu.matmul %165, %3, %cst_74 {dimension_numbers = #tpu.dot_dimension_numbers<[1], [0], [0], [1], [0, 0, 1, 1], [], []>} : vector<8x512xf32>, vector<512x128xf32>, vector<8x128xf32> -> vector<8x128xf32>
    %cst_75 = arith.constant dense<0.000000e+00> : vector<8xf32>
    %167 = vector.multi_reduction <add>, %166, %cst_75 [1] : vector<8x128xf32> to vector<8xf32>
    %168 = vector.shape_cast %167 : vector<8xf32> to vector<8x1xf32>
    %cst_76 = arith.constant 1.280000e+02 : f32
    %169 = vector.broadcast %cst_76 : f32 to vector<8x1xf32>
    %170 = arith.divf %168, %169 : vector<8x1xf32>
    %171 = vector.broadcast %170 : vector<8x1xf32> to vector<8x128xf32>
    %172 = arith.subf %166, %171 : vector<8x128xf32>
    %173 = arith.mulf %172, %172 : vector<8x128xf32>
    %cst_77 = arith.constant dense<0.000000e+00> : vector<8xf32>
    %174 = vector.multi_reduction <add>, %173, %cst_77 [1] : vector<8x128xf32> to vector<8xf32>
    %175 = vector.shape_cast %174 : vector<8xf32> to vector<8x1xf32>
    %cst_78 = arith.constant 1.280000e+02 : f32
    %176 = vector.broadcast %cst_78 : f32 to vector<8x1xf32>
    %177 = arith.divf %175, %176 : vector<8x1xf32>
    %178 = vector.broadcast %170 : vector<8x1xf32> to vector<8x128xf32>
    %179 = arith.subf %166, %178 : vector<8x128xf32>
    %cst_79 = arith.constant 9.99999974E-6 : f32
    %180 = vector.broadcast %cst_79 : f32 to vector<8x1xf32>
    %181 = arith.addf %177, %180 : vector<8x1xf32>
    %182 = math.rsqrt %181 : vector<8x1xf32>
    %183 = vector.broadcast %182 : vector<8x1xf32> to vector<8x128xf32>
    %184 = arith.mulf %179, %183 : vector<8x128xf32>
    %185 = vector.broadcast %4 : vector<1x128xf32> to vector<8x128xf32>
    %186 = arith.mulf %184, %185 : vector<8x128xf32>
    %c1_80 = arith.constant 1 : index
    %c0_81 = arith.constant 0 : index
    %c0_82 = arith.constant 0 : index
    %187 = vector.load %arg1[%c1_80, %c0_81, %c0_82] : memref<2x9x1xi32, #tpu.memory_space<vmem>>, vector<1x9x1xi32>
    %188 = vector.shape_cast %187 : vector<1x9x1xi32> to vector<9x1xi32>
    %c0_i32_83 = arith.constant 0 : i32
    %189 = vector.broadcast %c0_i32_83 : i32 to vector<9x1xi32>
    %190 = arith.cmpi eq, %188, %189 : vector<9x1xi32>
    %191 = vector.shape_cast %190 : vector<9x1xi1> to vector<9x1xi1>
    %192 = vector.broadcast %191 : vector<9x1xi1> to vector<9x128xi1>
    %193 = vector.shape_cast %8 : vector<1x128xf32> to vector<1x128xf32>
    %194 = vector.broadcast %193 : vector<1x128xf32> to vector<9x128xf32>
    %195 = vector.shape_cast %9 : vector<1x128xf32> to vector<1x128xf32>
    %196 = vector.broadcast %195 : vector<1x128xf32> to vector<9x128xf32>
    %197 = arith.select %192, %194, %196 : vector<9x128xi1>, vector<9x128xf32>
    %198 = tpu.concatenate %5, %186 in 0 : vector<1x128xf32>, vector<8x128xf32> -> vector<9x128xf32>
    %199 = arith.addf %198, %197 : vector<9x128xf32>
    %cst_84 = arith.constant dense<0.000000e+00> : vector<9xf32>
    %200 = vector.multi_reduction <add>, %199, %cst_84 [1] : vector<9x128xf32> to vector<9xf32>
    %201 = vector.shape_cast %200 : vector<9xf32> to vector<9x1xf32>
    %cst_85 = arith.constant 1.280000e+02 : f32
    %202 = vector.broadcast %cst_85 : f32 to vector<9x1xf32>
    %203 = arith.divf %201, %202 : vector<9x1xf32>
    %204 = vector.broadcast %203 : vector<9x1xf32> to vector<9x128xf32>
    %205 = arith.subf %199, %204 : vector<9x128xf32>
    %206 = arith.mulf %205, %205 : vector<9x128xf32>
    %cst_86 = arith.constant dense<0.000000e+00> : vector<9xf32>
    %207 = vector.multi_reduction <add>, %206, %cst_86 [1] : vector<9x128xf32> to vector<9xf32>
    %208 = vector.shape_cast %207 : vector<9xf32> to vector<9x1xf32>
    %cst_87 = arith.constant 1.280000e+02 : f32
    %209 = vector.broadcast %cst_87 : f32 to vector<9x1xf32>
    %210 = arith.divf %208, %209 : vector<9x1xf32>
    %211 = vector.broadcast %203 : vector<9x1xf32> to vector<9x128xf32>
    %212 = arith.subf %199, %211 : vector<9x128xf32>
    %cst_88 = arith.constant 9.99999996E-13 : f32
    %213 = vector.broadcast %cst_88 : f32 to vector<9x1xf32>
    %214 = arith.addf %210, %213 : vector<9x1xf32>
    %215 = math.rsqrt %214 : vector<9x1xf32>
    %216 = vector.broadcast %215 : vector<9x1xf32> to vector<9x128xf32>
    %217 = arith.mulf %212, %216 : vector<9x128xf32>
    %218 = vector.broadcast %6 : vector<1x128xf32> to vector<9x128xf32>
    %219 = arith.mulf %217, %218 : vector<9x128xf32>
    %220 = vector.broadcast %7 : vector<1x128xf32> to vector<9x128xf32>
    %221 = arith.addf %219, %220 : vector<9x128xf32>
    %c1_89 = arith.constant 1 : index
    %c0_90 = arith.constant 0 : index
    %c0_91 = arith.constant 0 : index
    %222 = vector.load %arg14[%c1_89, %c0_90, %c0_91] : memref<2x9x128xf32, #tpu.memory_space<vmem>>, vector<1x9x128xf32>
    %223 = vector.shape_cast %222 : vector<1x9x128xf32> to vector<9x128xf32>
    %224 = vector.shape_cast %221 : vector<9x128xf32> to vector<1x9x128xf32>
    tpu.vector_store %arg14[%c1_89, %c0_90, %c0_91], %224 {strides = array<i32>} : memref<2x9x128xf32, #tpu.memory_space<vmem>>, vector<1x9x128xf32>,
    return
  }
}

</mosaic_0001>

<bundles_post_ra>
// kernel: tpu_custom_call.1
= control target key start
LH: loop header
LB: loop body
LE: loop exit
PB: predicated region body
PF: predicated region fallthrough
CT: control target
= control target key end

     0   :  { %19 = vsyncpa [#allocation3], 0  ;;  %s3289_s0 = inlined_call_operand.vmem [shape: f32[2,8,128], index: 0, kind: input, shape index: {}]   ;;  %s3290_s1 = inlined_call_operand.vmem [shape: s32[2,9,1], index: 1, kind: input, shape index: {}]   ;;  %s3291_s2 = inlined_call_operand.vmem [shape: f32[8,128], index: 2, kind: input, shape index: {}]   ;;  %s3292_s3 = inlined_call_operand.vmem [shape: f32[1,128], index: 3, kind: input, shape index: {}]   ;;  %s3293_s4 = inlined_call_operand.vmem [shape: f32[1,128], index: 4, kind: input, shape index: {}]   ;;  %s3294_s5 = inlined_call_operand.hbm [shape: f32[128,512], index: 5, kind: input, shape index: {}]   ;;  %s3295_s6 = inlined_call_operand.hbm [shape: f32[128,128], index: 6, kind: input, shape index: {}]   ;;  %s3296_s7 = inlined_call_operand.hbm [shape: f32[128,128], index: 7, kind: input, shape index: {}]   ;;  %s3297_s8 = inlined_call_operand.hbm [shape: f32[512,128], index: 8, kind: input, shape index: {}]   ;;  %s3298_s9 = inlined_call_operand.vmem [shape: f32[1,128], index: 9, kind: input, shape index: {}]   ;;  %s3299_s10 = inlined_call_operand.vmem [shape: f32[2,128], index: 10, kind: input, shape index: {}]   ;;  %s3300_s11 = inlined_call_operand.vmem [shape: f32[1,128], index: 11, kind: input, shape index: {}]   ;;  %s3301_s12 = inlined_call_operand.vmem [shape: f32[1,128], index: 12, kind: input, shape index: {}]   ;;  %s3302_s13 = inlined_call_operand.vmem [shape: f32[1,128], index: 13, kind: input, shape index: {}]   ;;  %s3303_s14 = inlined_call_operand.vmem [shape: f32[2,9,128], index: 14, kind: output, shape index: {}]  }
   0x1   :  { %20 = vsyncpa [#allocation5], 0 }
   0x2   :  { %21 = vsyncpa [#allocation8], 0  ;;  %s2727_s29 = smov [#allocation4]   ;;  %s2633_s17 = scalar_lea.hbm %s3295_s6, 2048 }
   0x3   :  { %s49_s30 = sshll.u32 %s2727_s29, 4  ;;  %p2634_p0 = scmp.ne.s32.totalorder %s3295_s6, %s2633_s17  ;;  %s50_s30 = int_to_ptr.vmem [resolvable:$true] %s49_s30 }
   0x4   :  { %p2637_p1 = scmp.lt.u32.totalorder %s2633_s17, %s3295_s6 }
   0x6   :  { %p2639_p2 = pnand %p2637_p1, %p2634_p0 }
   0x8   :  { %2642 = shalt.err (!%p2639_p2)
}
   0x9   :  { %s2643_s22 = scalar_lea.vmem %s50_s30, 2048  ;;  %p2648_p4 = scmp.lt.s32.totalorder %s50_s30, %s50_s30 }
   0xa   :  { %p2644_p3 = scmp.ne.s32.totalorder %s50_s30, %s2643_s22  ;;  %p2649_p5 = scmp.lt.s32.totalorder %s2643_s22, %s2643_s22 }
   0xc   :  { %p2650_p6 = por %p2649_p5, %p2648_p4 }
   0xe   :  { %p2651_p7 = pnand %p2650_p6, %p2644_p3 }
  0x10   :  { %2654 = shalt.err (!%p2651_p7)
}
  0x11   :  { %s3304_s23 = smov 128   ;;  %s2729_s24 = smov 8  }
  0x12   :  { %55 = dma.hbm_to_vmem [thread:$0]  %s3295_s6, 2048, %s50_s30, [#allocation5], %s3304_s23, %s3304_s23, %s2729_s24  }
  0x13   :  { %s2730_s27 = smov [#allocation2]   ;;  %s2655_s16 = scalar_lea.hbm %s3294_s5, 8192 }
  0x14   :  { %s37_s28 = sshll.u32 %s2730_s27, 4  ;;  %p2656_p8 = scmp.ne.s32.totalorder %s3294_s5, %s2655_s16  ;;  %s38_s28 = int_to_ptr.vmem [resolvable:$true] %s37_s28 }
  0x15   :  { %p2659_p9 = scmp.lt.u32.totalorder %s2655_s16, %s3294_s5 }
  0x17   :  { %p2661_p10 = pnand %p2659_p9, %p2656_p8 }
  0x19   :  { %2664 = shalt.err (!%p2661_p10)
}
  0x1a   :  { %s2665_s21 = scalar_lea.vmem %s38_s28, 8192  ;;  %p2670_p12 = scmp.lt.s32.totalorder %s38_s28, %s38_s28 }
  0x1b   :  { %p2666_p11 = scmp.ne.s32.totalorder %s38_s28, %s2665_s21  ;;  %p2671_p13 = scmp.lt.s32.totalorder %s2665_s21, %s2665_s21 }
  0x1d   :  { %p2672_p0 = por %p2671_p13, %p2670_p12 }
  0x1f   :  { %p2673_p1 = pnand %p2672_p0, %p2666_p11 }
  0x21   :  { %2676 = shalt.err (!%p2673_p1)
}
  0x22   :  { %s2731_s6 = smov 512   ;;  %s2732_s30 = smov 32  }
  0x23   :  { %43 = dma.hbm_to_vmem [thread:$0]  %s3294_s5, 8192, %s38_s28, [#allocation3], %s2731_s6, %s2731_s6, %s2732_s30  }
  0x24   :  { %s2733_s26 = smov [#allocation6]   ;;  %s2734_s29 = smov [#allocation7]  }
  0x25   :  { %s61_s27 = sshll.u32 %s2733_s26, 4  ;;  %s73_s15 = sshll.u32 %s2734_s29, 4  ;;  %s62_s27 = int_to_ptr.vmem [resolvable:$true] %s61_s27  ;;  %s2844_s15 = int_to_ptr.vmem [resolvable:$true] %s73_s15 }
  0x26   :  { %s2677_s18 = scalar_lea.hbm %s3296_s7, 2048 }
  0x27   :  { %p2678_p2 = scmp.ne.s32.totalorder %s3296_s7, %s2677_s18  ;;  %p2681_p3 = scmp.lt.u32.totalorder %s2677_s18, %s3296_s7 }
  0x29   :  { %p2683_p4 = pnand %p2681_p3, %p2678_p2 }
  0x2b   :  { %2686 = shalt.err (!%p2683_p4)
}
  0x2c   :  { %s2687_s5 = scalar_lea.vmem %s62_s27, 2048  ;;  %p2692_p6 = scmp.lt.s32.totalorder %s62_s27, %s62_s27 }
  0x2d   :  { %p2688_p5 = scmp.ne.s32.totalorder %s62_s27, %s2687_s5  ;;  %p2693_p7 = scmp.lt.s32.totalorder %s2687_s5, %s2687_s5 }
  0x2f   :  { %p2694_p8 = por %p2693_p7, %p2692_p6 }
  0x31   :  { %p2695_p9 = pnand %p2694_p8, %p2688_p5 }
  0x33   :  { %2698 = shalt.err (!%p2695_p9)
}
  0x34   :  { %s3320_s28 = smov 128   ;;  %s2699_s23 = scalar_lea.hbm %s3297_s8, 8192 }
  0x35   :  { %67 = dma.hbm_to_vmem [thread:$0]  %s3296_s7, 2048, %s62_s27, [#allocation5], %s3320_s28, %s3320_s28, %s2729_s24  }
  0x36   :  { %p2700_p10 = scmp.ne.s32.totalorder %s3297_s8, %s2699_s23  ;;  %p2703_p11 = scmp.lt.u32.totalorder %s2699_s23, %s3297_s8 }
  0x38   :  { %p2705_p12 = pnand %p2703_p11, %p2700_p10 }
  0x3a   :  { %2708 = shalt.err (!%p2705_p12)
}
  0x3b   :  { %s2709_s18 = scalar_lea.vmem %s2844_s15, 8192  ;;  %p2714_p0 = scmp.lt.s32.totalorder %s2844_s15, %s2844_s15 }
  0x3c   :  { %p2710_p13 = scmp.ne.s32.totalorder %s2844_s15, %s2709_s18  ;;  %p2715_p1 = scmp.lt.s32.totalorder %s2709_s18, %s2709_s18 }
  0x3e   :  { %p2716_p2 = por %p2715_p1, %p2714_p0 }
  0x40   :  { %p2717_p3 = pnand %p2716_p2, %p2710_p13 }
  0x42   :  { %2720 = shalt.err (!%p2717_p3)
}
  0x43   :  { %79 = dma.hbm_to_vmem [thread:$0]  %s3297_s8, 8192, %s2844_s15, [#allocation8], %s3320_s28, %s3320_s28, %s2729_s24  }
  0x44   :  { %2721 = dma.done.wait [#allocation3], 8192  }
  0x45   :  { %2722 = vsyncadd [#allocation3], 4294959104 }
  0x46   :  { %2723 = dma.done.wait [#allocation5], 4096  }
  0x47   :  { %2724 = vsyncadd [#allocation5], 4294963200 }
  0x48   :  { %2725 = dma.done.wait [#allocation8], 8192  }
  0x49   :  { %2726 = vsyncadd [#allocation8], 4294959104  ;;  %v2884_v0 = vld [vmem:[%s3291_s2] sm:$0xff]  ;;  %v227_v2 = vld [vmem:[#allocation2 + $0x8] sm:$0xff]  ;;  %vm2737_vm0 = vmmov 0   ;;  %vm748_vm1 = vcmask 64512  }
  0x4a   :  { %207 = vadd.xlane.f32.xlu0 %v2884_v0  ;;  %v2890_v1 = vld [vmem:[%s3289_s0] sm:$0xff]  ;;  %v231_v3 = vld [vmem:[#allocation2 + $0x28] sm:$0xff]  ;;  %v229_v4 = vld [vmem:[#allocation2 + $0x18] sm:$0xff]  ;;  %vm1147_vm8 = vcmask 1040384  }
  0x4b   :  { %v2278_v5 = vpack.c.bf16 %v231_v3, %v227_v2  ;;  %v233_v6 = vld [vmem:[#allocation2 + $0x38] sm:$0xff]  ;;  %v226_v7 = vld [vmem:[#allocation2] sm:$0xff]  ;;  %v228_v11 = vld [vmem:[#allocation2 + $0x10] sm:$0xff] }
  0x4c   :  { %v230_v8 = vld [vmem:[#allocation2 + $0x20] sm:$0xff]  ;;  %v2310_v9 = vpack.c.bf16 %v233_v6, %v229_v4  ;;  %v232_v12 = vld [vmem:[#allocation2 + $0x30] sm:$0xff]  ;;  %v235_v13 = vld [vmem:[#allocation2 + $0x48] sm:$0xff] }
  0x4d   :  { %v2280_v10 = vpack.c.bf16 %v230_v8, %v226_v7  ;;  %2279 = vmatprep.subr.bf16.mxu0 %v2278_v5  ;;  %v2312_v14 = vpack.c.bf16 %v232_v12, %v228_v11  ;;  %v239_v15 = vld [vmem:[#allocation2 + $0x68] sm:$0xff]  ;;  %v237_v16 = vld [vmem:[#allocation2 + $0x58] sm:$0xff]  ;;  %v234_v20 = vld [vmem:[#allocation2 + $0x40] sm:$0xff] }
  0x4e   :  { %505 = vadd.xlane.f32.xlu0 %v2890_v1  ;;  %v241_v17 = vld [vmem:[#allocation2 + $0x78] sm:$0xff]  ;;  %2311 = vmatprep.subr.bf16.mxu1 %v2310_v9  ;;  %v2282_v18 = vpack.c.bf16 %v239_v15, %v235_v13  ;;  %v238_v21 = vld [vmem:[#allocation2 + $0x60] sm:$0xff]  ;;  %v236_v22 = vld [vmem:[#allocation2 + $0x50] sm:$0xff] }
  0x4f   :  { %2281 = vmatpush1.bf16.msra.mxu0 %v2280_v10  ;;  %v2314_v19 = vpack.c.bf16 %v241_v17, %v237_v16  ;;  %2313 = vmatpush1.bf16.msra.mxu1 %v2312_v14  ;;  %v2284_v23 = vpack.c.bf16 %v238_v21, %v234_v20  ;;  %v240_v24 = vld [vmem:[#allocation2 + $0x70] sm:$0xff]  ;;  %v243_v25 = vld [vmem:[#allocation2 + $0x88] sm:$0xff]  ;;  %v245_v29 = vld [vmem:[#allocation2 + $0x98] sm:$0xff] }
  0x50   :  { %v247_v26 = vld [vmem:[#allocation2 + $0xa8] sm:$0xff]  ;;  %2283 = vmatprep.subr.bf16.mxu0 %v2282_v18  ;;  %v2316_v27 = vpack.c.bf16 %v240_v24, %v236_v22  ;;  %v249_v30 = vld [vmem:[#allocation2 + $0xb8] sm:$0xff]  ;;  %v242_v31 = vld [vmem:[#allocation2 + $0x80] sm:$0xff] }
  0x51   :  { %2315 = vmatprep.subr.bf16.mxu1 %v2314_v19  ;;  %v2286_v28 = vpack.c.bf16 %v247_v26, %v243_v25  ;;  %v2318_v32 = vpack.c.bf16 %v249_v30, %v245_v29  ;;  %v246_v33 = vld [vmem:[#allocation2 + $0xa0] sm:$0xff]  ;;  %v244_v34 = vld [vmem:[#allocation2 + $0x90] sm:$0xff]  ;;  %v251_v37 = vld [vmem:[#allocation2 + $0xc8] sm:$0xff]  ;;  %v3306_v30 = vmov 0.0  }
  0x52   :  { %v248_v35 = vld [vmem:[#allocation2 + $0xb0] sm:$0xff]  ;;  %v2288_v36 = vpack.c.bf16 %v246_v33, %v242_v31  ;;  %v255_v38 = vld [vmem:[#allocation2 + $0xe8] sm:$0xff]  ;;  %v253_v39 = vld [vmem:[#allocation2 + $0xd8] sm:$0xff]  ;;  %354 = vmatprep.mubr.f32.mxu0 %v3306_v30  ;;  %425 = vmatprep.mubr.f32.mxu1 %v3306_v30 }
  0x53   :  { %2285 = vmatpush1.bf16.msra.mxu0 %v2284_v23  ;;  %2317 = vmatpush1.bf16.msra.mxu1 %v2316_v27  ;;  %v2320_v40 = vpack.c.bf16 %v248_v35, %v244_v34  ;;  %v2290_v41 = vpack.c.bf16 %v255_v38, %v251_v37  ;;  %v257_v42 = vld [vmem:[#allocation2 + $0xf8] sm:$0xff]  ;;  %v250_v43 = vld [vmem:[#allocation2 + $0xc0] sm:$0xff]  ;;  %v252_v46 = vld [vmem:[#allocation2 + $0xd0] sm:$0xff] }
  0x54   :  { %2287 = vmatprep.subr.bf16.mxu0 %v2286_v28  ;;  %v254_v44 = vld [vmem:[#allocation2 + $0xe0] sm:$0xff]  ;;  %2319 = vmatprep.subr.bf16.mxu1 %v2318_v32  ;;  %v2322_v45 = vpack.c.bf16 %v257_v42, %v253_v39  ;;  %v256_v47 = vld [vmem:[#allocation2 + $0xf0] sm:$0xff]  ;;  %v259_v58 = vld [vmem:[#allocation2 + $0x108] sm:$0xff] }
  0x55   :  { %v2292_v48 = vpack.c.bf16 %v254_v44, %v250_v43  ;;  %v2324_v49 = vpack.c.bf16 %v256_v47, %v252_v46  ;;  %v263_v59 = vld [vmem:[#allocation2 + $0x128] sm:$0xff]  ;;  %v261_v60 = vld [vmem:[#allocation2 + $0x118] sm:$0xff]  ;;  %v258_v63 = vld [vmem:[#allocation2 + $0x100] sm:$0xff]  ;;  %v3308_v43 = vmov 0.0|0.0  }
  0x56   :  { %v2294_v61 = vpack.c.bf16 %v263_v59, %v259_v58  ;;  %v265_v62 = vld [vmem:[#allocation2 + $0x138] sm:$0xff]  ;;  %v260_v4 = vld [vmem:[#allocation2 + $0x110] sm:$0xff]  ;;  %v271_v7 = vld [vmem:[#allocation2 + $0x168] sm:$0xff] }
  0x57   :  { %2289 = vmatpush1.bf16.msra.mxu0 %v2288_v36  ;;  %2321 = vmatpush1.bf16.msra.mxu1 %v2320_v40  ;;  %v2326_v2 = vpack.c.bf16 %v265_v62, %v261_v60  ;;  %v264_v5 = vld [vmem:[#allocation2 + $0x130] sm:$0xff]  ;;  %v269_v8 = vld [vmem:[#allocation2 + $0x158] sm:$0xff]  ;;  %v266_v11 = vld [vmem:[#allocation2 + $0x140] sm:$0xff] }
  0x58   :  { %2291 = vmatprep.subr.bf16.mxu0 %v2290_v41  ;;  %2323 = vmatprep.subr.bf16.mxu1 %v2322_v45  ;;  %v2328_v6 = vpack.c.bf16 %v264_v5, %v260_v4  ;;  %v273_v10 = vld [vmem:[#allocation2 + $0x178] sm:$0xff]  ;;  %v270_v12 = vld [vmem:[#allocation2 + $0x160] sm:$0xff]  ;;  %v268_v15 = vld [vmem:[#allocation2 + $0x150] sm:$0xff] }
  0x59   :  { %v2330_v13 = vpack.c.bf16 %v273_v10, %v269_v8  ;;  %v2300_v14 = vpack.c.bf16 %v270_v12, %v266_v11  ;;  %v272_v16 = vld [vmem:[#allocation2 + $0x170] sm:$0xff]  ;;  %v275_v18 = vld [vmem:[#allocation2 + $0x188] sm:$0xff]  ;;  %v277_v20 = vld [vmem:[#allocation2 + $0x198] sm:$0xff] }
  0x5a   :  { %v2332_v17 = vpack.c.bf16 %v272_v16, %v268_v15  ;;  %v279_v19 = vld [vmem:[#allocation2 + $0x1a8] sm:$0xff]  ;;  %v281_v22 = vld [vmem:[#allocation2 + $0x1b8] sm:$0xff]  ;;  %v274_v23 = vld [vmem:[#allocation2 + $0x180] sm:$0xff] }
  0x5b   :  { %2293 = vmatpush1.bf16.msra.mxu0 %v2292_v48  ;;  %2325 = vmatpush1.bf16.msra.mxu1 %v2324_v49  ;;  %v2302_v21 = vpack.c.bf16 %v279_v19, %v275_v18  ;;  %v278_v24 = vld [vmem:[#allocation2 + $0x1a0] sm:$0xff]  ;;  %v2334_v25 = vpack.c.bf16 %v281_v22, %v277_v20  ;;  %v276_v27 = vld [vmem:[#allocation2 + $0x190] sm:$0xff]  ;;  %v283_v29 = vld [vmem:[#allocation2 + $0x1c8] sm:$0xff] }
  0x5c   :  { %2295 = vmatprep.subr.bf16.mxu0 %v2294_v61  ;;  %2327 = vmatprep.subr.bf16.mxu1 %v2326_v2  ;;  %v2304_v26 = vpack.c.bf16 %v278_v24, %v274_v23  ;;  %v280_v28 = vld [vmem:[#allocation2 + $0x1b0] sm:$0xff]  ;;  %v287_v32 = vld [vmem:[#allocation2 + $0x1e8] sm:$0xff]  ;;  %v285_v33 = vld [vmem:[#allocation2 + $0x1d8] sm:$0xff] }
  0x5d   :  { %v2336_v31 = vpack.c.bf16 %v280_v28, %v276_v27  ;;  %v289_v34 = vld [vmem:[#allocation2 + $0x1f8] sm:$0xff]  ;;  %v2306_v35 = vpack.c.bf16 %v287_v32, %v283_v29  ;;  %v282_v37 = vld [vmem:[#allocation2 + $0x1c0] sm:$0xff]  ;;  %v284_v39 = vld [vmem:[#allocation2 + $0x1d0] sm:$0xff] }
  0x5e   :  { %v2338_v36 = vpack.c.bf16 %v289_v34, %v285_v33  ;;  %v286_v38 = vld [vmem:[#allocation2 + $0x1e0] sm:$0xff]  ;;  %v288_v41 = vld [vmem:[#allocation2 + $0x1f0] sm:$0xff]  ;;  %v104_v48 = vld [vmem:[#allocation4 + $0x8] sm:$0xff] }
  0x5f   :  { %2329 = vmatpush1.bf16.msra.mxu1 %v2328_v6  ;;  %v2308_v40 = vpack.c.bf16 %v286_v38, %v282_v37  ;;  %v2340_v42 = vpack.c.bf16 %v288_v41, %v284_v39  ;;  %v103_v47 = vld [vmem:[#allocation4] sm:$0xff]  ;;  %v105_v58 = vld [vmem:[#allocation4 + $0x10] sm:$0xff]  ;;  %v106_v60 = vld [vmem:[#allocation4 + $0x18] sm:$0xff] }
  0x60   :  { %2331 = vmatprep.subr.bf16.mxu1 %v2330_v13  ;;  %v119_v49 = vld [vmem:[#allocation6] sm:$0xff]  ;;  %v121_v61 = vld [vmem:[#allocation6 + $0x10] sm:$0xff]  ;;  %v122_v62 = vld [vmem:[#allocation6 + $0x18] sm:$0xff] }
  0x61   :  { %v123_v4 = vld [vmem:[#allocation6 + $0x20] sm:$0xff]  ;;  %v124_v5 = vld [vmem:[#allocation6 + $0x28] sm:$0xff]  ;;  %v109_v8 = vld [vmem:[#allocation4 + $0x30] sm:$0xff] }
  0x62   :  { %v125_v10 = vld [vmem:[#allocation6 + $0x30] sm:$0xff]  ;;  %v126_v11 = vld [vmem:[#allocation6 + $0x38] sm:$0xff]  ;;  %v111_v15 = vld [vmem:[#allocation4 + $0x40] sm:$0xff] }
  0x63   :  { %2333 = vmatpush1.bf16.msra.mxu1 %v2332_v17  ;;  %v112_v16 = vld [vmem:[#allocation4 + $0x48] sm:$0xff]  ;;  %v127_v17 = vld [vmem:[#allocation6 + $0x40] sm:$0xff]  ;;  %v114_v22 = vld [vmem:[#allocation4 + $0x58] sm:$0xff] }
  0x64   :  { %2335 = vmatprep.subr.bf16.mxu1 %v2334_v25  ;;  %v128_v18 = vld [vmem:[#allocation6 + $0x48] sm:$0xff]  ;;  %v2945_v19 = vpack.c.bf16 %v112_v16, %v111_v15  ;;  %v129_v23 = vld [vmem:[#allocation6 + $0x50] sm:$0xff]  ;;  %v130_v24 = vld [vmem:[#allocation6 + $0x58] sm:$0xff] }
  0x65   :  { %v2947_v20 = vpack.c.bf16 %v128_v18, %v127_v17  ;;  %v115_v27 = vld [vmem:[#allocation4 + $0x60] sm:$0xff]  ;;  %v116_v28 = vld [vmem:[#allocation4 + $0x68] sm:$0xff]  ;;  %v117_v34 = vld [vmem:[#allocation4 + $0x70] sm:$0xff] }
  0x66   :  { %v131_v29 = vld [vmem:[#allocation6 + $0x60] sm:$0xff]  ;;  %v2961_v32 = vpack.c.bf16 %v116_v28, %v115_v27  ;;  %v134_v37 = vld [vmem:[#allocation6 + $0x78] sm:$0xff] }
  0x67   :  { %2337 = vmatpush1.bf16.msra.mxu1 %v2336_v31  ;;  %v132_v31 = vld [vmem:[#allocation6 + $0x68] sm:$0xff] }
  0x68   :  { %2339 = vmatprep.subr.bf16.mxu1 %v2338_v36  ;;  %v2963_v33 = vpack.c.bf16 %v132_v31, %v131_v29  ;;  %v133_v36 = vld [vmem:[#allocation6 + $0x70] sm:$0xff] }
  0x6b   :  { %2341 = vmatpush1.bf16.msra.mxu1 %v2340_v42  ;;  %v2979_v42 = vld [vmem:[%s3293_s4] ss:$0 sm:$0xff] }
  0x6c   :  { %2366 = vmatprep.subr.bf16.mxu1 %v3308_v43 }
  0xd7   :  { %v208_v50 = vpop.xlane.xlu0 %207 }
  0xd8   :  { %v210_v51 = vmul.f32 0.0078125, %v208_v50  ;;  %v120_v50 = vld [vmem:[#allocation6 + $0x8] sm:$0xff] }
  0xda   :  { %v2894_v52 = vsub.f32 %v2884_v0, %v210_v51  ;;  %v262_v0 = vld [vmem:[#allocation2 + $0x120] sm:$0xff] }
  0xdb   :  { %v506_v53 = vpop.xlane.xlu0 %505  ;;  %v2296_v3 = vpack.c.bf16 %v262_v0, %v258_v63  ;;  %v2917_v63 = vpack.c.bf16 %v106_v60, %v105_v58  ;;  %v2919_v0 = vpack.c.bf16 %v122_v62, %v121_v61 }
  0xdc   :  { %v507_v54 = vmul.f32 0.0078125, %v506_v53  ;;  %v212_v55 = vmul.f32 %v2894_v52, %v2894_v52  ;;  %v1858_v53 = vld [vmem:[%s3292_s3] ss:$0 sm:$0xff] }
  0xdd   :  { %2297 = vmatpush1.bf16.msra.mxu0 %v2296_v3  ;;  %v108_v3 = vld [vmem:[#allocation4 + $0x28] sm:$0xff] }
  0xde   :  { %v2899_v56 = vsub.f32 %v2890_v1, %v507_v54  ;;  %213 = vadd.xlane.f32.xlu1 %v212_v55  ;;  %v267_v1 = vld [vmem:[#allocation2 + $0x148] sm:$0xff]  ;;  %v2911_v55 = vpack.c.bf16 %v104_v48, %v103_v47  ;;  %v443_v47 = vlaneseq  ;;  %v2739_v48 = vmov 1966171168  }
  0xdf   :  { %v2298_v9 = vpack.c.bf16 %v271_v7, %v267_v1  ;;  %v2931_v7 = vpack.c.bf16 %v124_v5, %v123_v4 }
  0xe0   :  { %v509_v57 = vmul.f32 %v2899_v56, %v2899_v56 }
  0xe1   :  { %2299 = vmatprep.subr.bf16.mxu0 %v2298_v9  ;;  %v110_v9 = vld [vmem:[#allocation4 + $0x38] sm:$0xff] }
  0xe2   :  { %510 = vadd.xlane.f32.xlu1 %v509_v57  ;;  %2301 = vmatpush1.bf16.msra.mxu0 %v2300_v14  ;;  %v2913_v57 = vpack.c.bf16 %v120_v50, %v119_v49  ;;  %v2937_v13 = vpack.c.bf16 %v110_v9, %v109_v8  ;;  %v2939_v14 = vpack.c.bf16 %v126_v11, %v125_v10  ;;  %v477_v49 = vunpack.c.l.s4 %v2739_v48 }
  0xe3   :  { %2303 = vmatprep.subr.bf16.mxu0 %v2302_v21  ;;  %v113_v21 = vld [vmem:[#allocation4 + $0x50] sm:$0xff] }
  0xe4   :  { %v2953_v25 = vpack.c.bf16 %v114_v22, %v113_v21 }
  0xe6   :  { %2305 = vmatpush1.bf16.msra.mxu0 %v2304_v26  ;;  %v2955_v26 = vpack.c.bf16 %v130_v24, %v129_v23 }
  0xe7   :  { %2307 = vmatprep.subr.bf16.mxu0 %v2306_v35  ;;  %v118_v35 = vld [vmem:[#allocation4 + $0x78] sm:$0xff] }
  0xe8   :  { %v2969_v39 = vpack.c.bf16 %v118_v35, %v117_v34 }
  0xea   :  { %2309 = vmatpush1.bf16.msra.mxu0 %v2308_v40  ;;  %v2971_v40 = vpack.c.bf16 %v134_v37, %v133_v36 }
  0xeb   :  { %2342 = vmatprep.subr.bf16.mxu0 %v3308_v43 }
 0x16b   :  { %v214_v44 = vpop.xlane.xlu1 %213 }
 0x16c   :  { %v215_v45 = vmul.f32 0.0078125, %v214_v44 }
 0x16e   :  { %v216_v46 = vadd.f32 1e-05, %v215_v45  ;;  %v2738_v45 = vmov 1983009808  }
 0x16f   :  { %v511_v2 = vpop.xlane.xlu1 %510 }
 0x170   :  { %2583 = vrsqrt.f32 %v216_v46  ;;  %v512_v6 = vmul.f32 0.0078125, %v511_v2  ;;  %v441_v46 = vunpack.c.l.s4 %v2738_v45 }
 0x172   :  { %v513_v12 = vadd.f32 1e-05, %v512_v6  ;;  %v442_v50 = vunpack.c.0.s8 %v441_v46 }
 0x174   :  { %2585 = vrsqrt.f32 %v513_v12 }
 0x17a   :  { %v2584_v51 = vpop.eup %2583 }
 0x17b   :  { %v218_v54 = vmul.f32 %v2584_v51, %v2894_v52  ;;  %v107_v52 = vld [vmem:[#allocation4 + $0x20] sm:$0xff]  ;;  %v478_v51 = vunpack.c.0.s8 %v477_v49 }
 0x17c   :  { %v2929_v1 = vpack.c.bf16 %v108_v3, %v107_v52 }
 0x17d   :  { %v225_v59 = vmul.f32 %v1858_v53, %v218_v54 }
 0x17e   :  { %v2586_v38 = vpop.eup %2585 }
 0x17f   :  { %355 = vmatmul.mubr.f32.vlgmr.msra.gmra.mrb[0].mxu0 %v225_v59  ;;  %426 = vmatmul.mubr.f32.vlgmr.msra.gmra.mrb[0].mxu1 %v225_v59  ;;  %v515_v41 = vmul.f32 %v2586_v38, %v2899_v56  ;;  %v2984_v56 = vshrl.u32 %v443_v47, 7 }
 0x180   :  { %2344 = vmatpush3.bf16.msra.mxu0 %v2911_v55  ;;  %2368 = vmatpush3.bf16.msra.mxu1 %v2913_v57 }
 0x181   :  { %2345 = vmatprep.subr.bf16.mxu0 %v3308_v43  ;;  %2369 = vmatprep.subr.bf16.mxu1 %v3308_v43  ;;  %v522_v44 = vmul.f32 %v2979_v42, %v515_v41  ;;  %v2987_v58 = vsub.s32 %v442_v50, %v2984_v56  ;;  %v481_v3 = vsub.s32 %v478_v51, %v2984_v56 }
 0x182   :  { %2138 = vmatprep.mubr.msk.f32.mxu0 %vm2737_vm0, %v3306_v30  ;;  %2173 = vmatprep.mubr.msk.f32.mxu1 %vm2737_vm0, %v3306_v30 }
 0x184   :  { %2347 = vmatpush3.bf16.msra.mxu0 %v2917_v63  ;;  %2371 = vmatpush3.bf16.msra.mxu1 %v2919_v0 }
 0x185   :  { %2348 = vmatprep.subr.bf16.mxu0 %v3308_v43  ;;  %2372 = vmatprep.subr.bf16.mxu1 %v3308_v43 }
 0x188   :  { %2350 = vmatpush3.bf16.msra.mxu0 %v2929_v1  ;;  %2374 = vmatpush3.bf16.msra.mxu1 %v2931_v7 }
 0x189   :  { %2351 = vmatprep.subr.bf16.mxu0 %v3308_v43  ;;  %2375 = vmatprep.subr.bf16.mxu1 %v3308_v43 }
 0x18c   :  { %2353 = vmatpush3.bf16.msra.mxu0 %v2937_v13  ;;  %2377 = vmatpush3.bf16.msra.mxu1 %v2939_v14 }
 0x18d   :  { %2354 = vmatprep.subr.bf16.mxu0 %v3308_v43  ;;  %2378 = vmatprep.subr.bf16.mxu1 %v3308_v43 }
 0x190   :  { %2356 = vmatpush3.bf16.msra.mxu0 %v2945_v19  ;;  %2380 = vmatpush3.bf16.msra.mxu1 %v2947_v20 }
 0x191   :  { %2357 = vmatprep.subr.bf16.mxu0 %v3308_v43  ;;  %2381 = vmatprep.subr.bf16.mxu1 %v3308_v43 }
 0x194   :  { %2359 = vmatpush3.bf16.msra.mxu0 %v2953_v25  ;;  %2383 = vmatpush3.bf16.msra.mxu1 %v2955_v26 }
 0x195   :  { %2360 = vmatprep.subr.bf16.mxu0 %v3308_v43  ;;  %2384 = vmatprep.subr.bf16.mxu1 %v3308_v43 }
 0x198   :  { %2362 = vmatpush3.bf16.msra.mxu0 %v2961_v32  ;;  %2386 = vmatpush3.bf16.msra.mxu1 %v2963_v33 }
 0x199   :  { %2363 = vmatprep.subr.bf16.mxu0 %v3308_v43  ;;  %2387 = vmatprep.subr.bf16.mxu1 %v3308_v43 }
 0x19c   :  { %2365 = vmatpush3.bf16.msra.mxu0 %v2969_v39  ;;  %2389 = vmatpush3.bf16.msra.mxu1 %v2971_v40 }
 0x19f   :  { %2139 = vmatmul.mubr.f32.vlgmr.msra.gmra.mrb[2].mxu0 %v522_v44  ;;  %2174 = vmatmul.mubr.f32.vlgmr.msra.gmra.mrb[2].mxu1 %v522_v44 }
 0x252   :  { %v356_v53 = vpop.f32.mrb[0].mxu0  ;;  %v427_v54 = vpop.f32.mrb[0].mxu1 }
 0x253   :  { %v358_v59 = vpop.f32.mrb[1].mxu0  ;;  %v429_v60 = vpop.f32.mrb[1].mxu1 }
 0x254   :  { %v436_v61 = vcombine.low %v356_v53, %v358_v59  ;;  %v437_v62 = vcombine.high %v356_v53, %v358_v59  ;;  %v438_v52 = vcombine.low %v427_v54, %v429_v60  ;;  %v439_v2 = vcombine.high %v427_v54, %v429_v60 }
 0x256   :  { %v446_v4 = vrot.slane %v436_v61, %v2987_v58  ;;  %v453_v5 = vrot.slane %v437_v62, %v2987_v58  ;;  %v460_v6 = vrot.slane %v438_v52, %v2987_v58  ;;  %v467_v8 = vrot.slane %v439_v2, %v2987_v58 }
 0x258   :  { %v468_v9 = vcombine.low %v446_v4, %v460_v6  ;;  %v469_v10 = vcombine.high %v446_v4, %v460_v6  ;;  %v470_v11 = vcombine.low %v453_v5, %v467_v8  ;;  %v471_v12 = vcombine.high %v453_v5, %v467_v8  ;;  %v1869_v5 = vld [vmem:[%s3289_s0 + $0x8] sm:$0xff] }
 0x25a   :  { %v2994_v15 = vrot.slane %v468_v9, %v481_v3  ;;  %v2997_v22 = vrot.slane %v469_v10, %v481_v3  ;;  %v2999_v23 = vrot.slane %v470_v11, %v481_v3  ;;  %v3003_v24 = vrot.slane %v471_v12, %v481_v3 }
 0x25c   :  { %2178 = vmatprep.mubr.f32.mxu0 %v2994_v15 }
 0x272   :  { %v589_v16 = vpop.f32.mrb[2].mxu0  ;;  %v659_v17 = vpop.f32.mrb[2].mxu1 }
 0x273   :  { %v2140_v18 = vpop.f32.mrb[3].mxu0  ;;  %v2175_v21 = vpop.f32.mrb[3].mxu1  ;;  %2176 = vmatprep.subr.mxu0 %v589_v16  ;;  %2184 = vmatprep.subr.mxu1 %v659_v17 }
 0x274   :  { %2177 = vmatpush3.xpose.msra.mxu0 %v589_v16  ;;  %2185 = vmatpush3.msra.mxu1 %v659_v17 }
 0x277   :  { %2179 = vmatmul.mubr.f32.vlgmr.msra.gmra.mrb[4].mxu0 %v2997_v22 }
 0x278   :  { %2181 = vmatprep.mubr.f32.mxu0 %v2999_v23 }
 0x27b   :  { %2182 = vmatmul.mubr.f32.gmra.mrb[6].mxu0 %v3003_v24 }
 0x34a   :  { %v2180_v27 = vpop.f32.mrb[4].mxu0 }
 0x34b   :  { %v729_v28 = vpop.f32.mrb[5].mxu0  ;;  %v752_v29 = vsel %vm748_vm1, %v2180_v27, -inf }
 0x34c   :  { %753 = vmax.xlane.f32.xlu1 %v752_v29  ;;  %v749_v31 = vsel %vm748_vm1, %v729_v28, -inf }
 0x34d   :  { %750 = vmax.xlane.f32.xlu0 %v749_v31 }
 0x34e   :  { %v2183_v34 = vpop.f32.mrb[6].mxu0 }
 0x34f   :  { %v739_v35 = vpop.f32.mrb[7].mxu0  ;;  %v758_v36 = vsel %vm748_vm1, %v2183_v34, -inf }
 0x350   :  { %759 = vmax.xlane.f32.xlu1 %v758_v36  ;;  %v755_v37 = vsel %vm748_vm1, %v739_v35, -inf  ;;  %v151_v36 = vld [vmem:[#allocation7 + $0x80] sm:$0xff] }
 0x351   :  { %756 = vmax.xlane.f32.xlu0 %v755_v37  ;;  %v152_v37 = vld [vmem:[#allocation7 + $0x88] sm:$0xff] }
 0x3d9   :  { %v754_v38 = vpop.xlane.xlu1 %753 }
 0x3da   :  { %v762_v41 = vsub.f32 %v2180_v27, %v754_v38  ;;  %v751_v44 = vpop.xlane.xlu0 %750  ;;  %v183_v38 = vld [vmem:[#allocation7 + $0x180] sm:$0xff] }
 0x3db   :  { %v761_v45 = vsub.f32 %v729_v28, %v751_v44  ;;  %v184_v44 = vld [vmem:[#allocation7 + $0x188] sm:$0xff] }
 0x3dc   :  { %v767_v46 = vmul.f32 1.442695, %v762_v41  ;;  %v3025_v41 = vpack.c.bf16 %v152_v37, %v151_v36 }
 0x3dd   :  { %v765_v47 = vmul.f32 1.442695, %v761_v45  ;;  %v760_v48 = vpop.xlane.xlu1 %759  ;;  %v135_v45 = vld [vmem:[#allocation7] sm:$0xff] }
 0x3de   :  { %2587 = vpow2.f32 %v767_v46  ;;  %v764_v49 = vsub.f32 %v2183_v34, %v760_v48  ;;  %v757_v50 = vpop.xlane.xlu0 %756  ;;  %v136_v46 = vld [vmem:[#allocation7 + $0x8] sm:$0xff]  ;;  %2391 = vmatprep.subr.bf16.mxu0 %v3025_v41 }
 0x3df   :  { %2589 = vpow2.f32 %v765_v47  ;;  %v763_v51 = vsub.f32 %v739_v35, %v757_v50  ;;  %v3027_v47 = vpack.c.bf16 %v184_v44, %v183_v38  ;;  %v3029_v48 = vpack.c.bf16 %v136_v46, %v135_v45  ;;  %v168_v50 = vld [vmem:[#allocation7 + $0x108] sm:$0xff]  ;;  %v190_v38 = vld [vmem:[#allocation7 + $0x1b8] sm:$0xff]  ;;  %v141_v44 = vld [vmem:[#allocation7 + $0x30] sm:$0xff] }
 0x3e0   :  { %v771_v53 = vmul.f32 1.442695, %v764_v49  ;;  %v167_v49 = vld [vmem:[#allocation7 + $0x100] sm:$0xff]  ;;  %v142_v45 = vld [vmem:[#allocation7 + $0x38] sm:$0xff] }
 0x3e1   :  { %v769_v54 = vmul.f32 1.442695, %v763_v51  ;;  %v153_v51 = vld [vmem:[#allocation7 + $0x90] sm:$0xff]  ;;  %2423 = vmatprep.subr.bf16.mxu1 %v3027_v47  ;;  %2393 = vmatpush3.bf16.msra.mxu0 %v3029_v48 }
 0x3e2   :  { %2591 = vpow2.f32 %v771_v53  ;;  %v3032_v53 = vpack.c.bf16 %v168_v50, %v167_v49  ;;  %v173_v49 = vld [vmem:[#allocation7 + $0x130] sm:$0xff]  ;;  %v174_v50 = vld [vmem:[#allocation7 + $0x138] sm:$0xff] }
 0x3e3   :  { %2593 = vpow2.f32 %v769_v54  ;;  %v154_v54 = vld [vmem:[#allocation7 + $0x98] sm:$0xff] }
 0x3e8   :  { %v2588_v59 = vpop.eup %2587 }
 0x3e9   :  { %v2590_v60 = vpop.eup %2589  ;;  %v776_v61 = vsel %vm748_vm1, %v2588_v59, 0.0 }
 0x3ea   :  { %777 = vadd.xlane.f32.xlu1 %v776_v61  ;;  %v773_v62 = vsel %vm748_vm1, %v2590_v60, 0.0  ;;  %v3036_v61 = vpack.c.bf16 %v154_v54, %v153_v51  ;;  %v159_v51 = vld [vmem:[#allocation7 + $0xc0] sm:$0xff]  ;;  %v160_v54 = vld [vmem:[#allocation7 + $0xc8] sm:$0xff] }
 0x3eb   :  { %774 = vadd.xlane.f32.xlu0 %v773_v62 }
 0x3ec   :  { %v2592_v52 = vpop.eup %2591  ;;  %2395 = vmatprep.subr.bf16.mxu0 %v3036_v61 }
 0x3ed   :  { %v2594_v2 = vpop.eup %2593  ;;  %v782_v3 = vsel %vm748_vm1, %v2592_v52, 0.0 }
 0x3ee   :  { %783 = vadd.xlane.f32.xlu1 %v782_v3  ;;  %v779_v4 = vsel %vm748_vm1, %v2594_v2, 0.0  ;;  %v169_v3 = vld [vmem:[#allocation7 + $0x110] sm:$0xff] }
 0x3ef   :  { %780 = vadd.xlane.f32.xlu0 %v779_v4 }
 0x3f3   :  { %1195 = vadd.xlane.f32.xlu0 %v1869_v5 }
 0x477   :  { %v778_v6 = vpop.xlane.xlu1 %777 }
 0x478   :  { %2595 = vrcp.f32 %v778_v6  ;;  %v775_v8 = vpop.xlane.xlu0 %774  ;;  %v155_v6 = vld [vmem:[#allocation7 + $0xa0] sm:$0xff] }
 0x479   :  { %2597 = vrcp.f32 %v775_v8  ;;  %v156_v8 = vld [vmem:[#allocation7 + $0xa8] sm:$0xff] }
 0x47b   :  { %v784_v9 = vpop.xlane.xlu1 %783 }
 0x47c   :  { %2599 = vrcp.f32 %v784_v9  ;;  %v781_v10 = vpop.xlane.xlu0 %780 }
 0x47d   :  { %2601 = vrcp.f32 %v781_v10  ;;  %v3047_v10 = vpack.c.bf16 %v156_v8, %v155_v6  ;;  %v144_v6 = vld [vmem:[#allocation7 + $0x48] sm:$0xff] }
 0x480   :  { %v1196_v11 = vpop.xlane.xlu0 %1195 }
 0x481   :  { %v1197_v12 = vmul.f32 0.0078125, %v1196_v11  ;;  %v187_v11 = vld [vmem:[#allocation7 + $0x1a0] sm:$0xff] }
 0x482   :  { %v2596_v16 = vpop.eup %2595 }
 0x483   :  { %v2598_v17 = vpop.eup %2597  ;;  %v3017_v18 = vsub.f32 %v1869_v5, %v1197_v12  ;;  %v788_v27 = vmul.f32 %v2596_v16, %v2588_v59  ;;  %v185_v59 = vld [vmem:[#allocation7 + $0x190] sm:$0xff]  ;;  %v170_v5 = vld [vmem:[#allocation7 + $0x118] sm:$0xff]  ;;  %v188_v12 = vld [vmem:[#allocation7 + $0x1a8] sm:$0xff] }
 0x484   :  { %v786_v21 = vmul.f32 %v2598_v17, %v2590_v60  ;;  %v186_v60 = vld [vmem:[#allocation7 + $0x198] sm:$0xff]  ;;  %v3045_v9 = vpack.c.bf16 %v170_v5, %v169_v3  ;;  %v139_v16 = vld [vmem:[#allocation7 + $0x20] sm:$0xff]  ;;  %v3049_v17 = vpack.c.bf16 %v188_v12, %v187_v11  ;;  %v3070_v3 = vpack.c.bf16 %v160_v54, %v159_v51  ;;  %v176_v12 = vld [vmem:[#allocation7 + $0x148] sm:$0xff] }
 0x485   :  { %v1199_v28 = vmul.f32 %v3017_v18, %v3017_v18  ;;  %v3038_v62 = vpack.c.bf16 %v186_v60, %v185_v59  ;;  %v191_v59 = vld [vmem:[#allocation7 + $0x1c0] sm:$0xff]  ;;  %v192_v60 = vld [vmem:[#allocation7 + $0x1c8] sm:$0xff]  ;;  %v178_v51 = vld [vmem:[#allocation7 + $0x158] sm:$0xff] }
 0x486   :  { %v2600_v29 = vpop.eup %2599  ;;  %2186 = vmatprep.mubr.msk.f32.mxu1 %vm748_vm1, %v786_v21  ;;  %v140_v21 = vld [vmem:[#allocation7 + $0x28] sm:$0xff]  ;;  %v143_v5 = vld [vmem:[#allocation7 + $0x40] sm:$0xff]  ;;  %v3073_v8 = vpack.c.bf16 %v192_v60, %v191_v59 }
 0x487   :  { %v2602_v31 = vpop.eup %2601  ;;  %2187 = vmatmul.mubr.msk.f32.vlgmr.msra.gmra.mrb[4].mxu1 %vm748_vm1, %v788_v27  ;;  %1200 = vadd.xlane.f32.xlu1 %v1199_v28  ;;  %v792_v35 = vmul.f32 %v2600_v29, %v2592_v52  ;;  %v137_v52 = vld [vmem:[#allocation7 + $0x10] sm:$0xff]  ;;  %v171_v27 = vld [vmem:[#allocation7 + $0x120] sm:$0xff]  ;;  %v172_v28 = vld [vmem:[#allocation7 + $0x128] sm:$0xff]  ;;  %v3052_v29 = vpack.c.bf16 %v140_v21, %v139_v16  ;;  %v3076_v16 = vpack.c.bf16 %v144_v6, %v143_v5 }
 0x488   :  { %v790_v34 = vmul.f32 %v2602_v31, %v2594_v2  ;;  %v138_v2 = vld [vmem:[#allocation7 + $0x18] sm:$0xff]  ;;  %2425 = vmatpush3.bf16.msra.mxu1 %v3032_v53  ;;  %v157_v31 = vld [vmem:[#allocation7 + $0xb0] sm:$0xff]  ;;  %v3056_v36 = vpack.c.bf16 %v172_v28, %v171_v27  ;;  %3323 = vst [vmem:[#allocation14_spill] sm:$0xff] %v3073_v8  ;;  %v175_v11 = vld [vmem:[#allocation7 + $0x140] sm:$0xff] }
 0x489   :  { %v3041_v4 = vpack.c.bf16 %v138_v2, %v137_v52  ;;  %2427 = vmatprep.subr.bf16.mxu1 %v3038_v62  ;;  %v3064_v52 = vpack.c.bf16 %v142_v45, %v141_v44  ;;  %v3068_v2 = vpack.c.bf16 %v174_v50, %v173_v49  ;;  %v3080_v21 = vpack.c.bf16 %v176_v12, %v175_v11  ;;  %v161_v27 = vld [vmem:[#allocation7 + $0xd0] sm:$0xff]  ;;  %v162_v28 = vld [vmem:[#allocation7 + $0xd8] sm:$0xff]  ;;  %v163_v59 = vld [vmem:[#allocation7 + $0xe0] sm:$0xff] }
 0x48a   :  { %2189 = vmatprep.mubr.msk.f32.mxu1 %vm748_vm1, %v790_v34  ;;  %v158_v34 = vld [vmem:[#allocation7 + $0xb8] sm:$0xff]  ;;  %v177_v50 = vld [vmem:[#allocation7 + $0x150] sm:$0xff]  ;;  %v164_v60 = vld [vmem:[#allocation7 + $0xe8] sm:$0xff] }
 0x48b   :  { %2190 = vmatmul.mubr.msk.f32.gmra.mrb[6].mxu1 %vm748_vm1, %v792_v35  ;;  %2397 = vmatpush3.bf16.msra.mxu0 %v3041_v4  ;;  %v189_v35 = vld [vmem:[#allocation7 + $0x1b0] sm:$0xff]  ;;  %v3058_v37 = vpack.c.bf16 %v158_v34, %v157_v31  ;;  %3322 = vst [vmem:[#allocation13_spill] sm:$0xff] %v3068_v2  ;;  %3324 = vst [vmem:[#allocation15_spill] sm:$0xff] %v3080_v21  ;;  %v3085_v34 = vpack.c.bf16 %v162_v28, %v161_v27  ;;  %v146_v44 = vld [vmem:[#allocation7 + $0x58] sm:$0xff] }
 0x48c   :  { %2429 = vmatpush3.bf16.msra.mxu1 %v3045_v9  ;;  %2399 = vmatprep.subr.bf16.mxu0 %v3047_v10  ;;  %v3061_v46 = vpack.c.bf16 %v190_v38, %v189_v35  ;;  %v193_v31 = vld [vmem:[#allocation7 + $0x1d0] sm:$0xff]  ;;  %v194_v35 = vld [vmem:[#allocation7 + $0x1d8] sm:$0xff]  ;;  %v3092_v54 = vpack.c.bf16 %v178_v51, %v177_v50  ;;  %v195_v5 = vld [vmem:[#allocation7 + $0x1e0] sm:$0xff]  ;;  %v3097_v6 = vpack.c.bf16 %v164_v60, %v163_v59 }
 0x48d   :  { %2431 = vmatprep.subr.bf16.mxu1 %v3049_v17  ;;  %v145_v38 = vld [vmem:[#allocation7 + $0x50] sm:$0xff]  ;;  %v3087_v45 = vpack.c.bf16 %v194_v35, %v193_v31  ;;  %v196_v11 = vld [vmem:[#allocation7 + $0x1e8] sm:$0xff]  ;;  %v147_v12 = vld [vmem:[#allocation7 + $0x60] sm:$0xff] }
 0x48e   :  { %3321 = vst [vmem:[#allocation12_spill] sm:$0xff] %v3061_v46  ;;  %v3089_v49 = vpack.c.bf16 %v146_v44, %v145_v38  ;;  %3326 = vst [vmem:[#allocation17_spill] sm:$0xff] %v3092_v54  ;;  %v148_v27 = vld [vmem:[#allocation7 + $0x68] sm:$0xff]  ;;  %v3099_v28 = vpack.c.bf16 %v196_v11, %v195_v5  ;;  %v179_v35 = vld [vmem:[#allocation7 + $0x160] sm:$0xff] }
 0x48f   :  { %2401 = vmatpush3.bf16.msra.mxu0 %v3052_v29  ;;  %3325 = vst [vmem:[#allocation16_spill] sm:$0xff] %v3087_v45  ;;  %v3101_v31 = vpack.c.bf16 %v148_v27, %v147_v12  ;;  %v180_v38 = vld [vmem:[#allocation7 + $0x168] sm:$0xff]  ;;  %v165_v50 = vld [vmem:[#allocation7 + $0xf0] sm:$0xff]  ;;  %v166_v51 = vld [vmem:[#allocation7 + $0xf8] sm:$0xff] }
 0x490   :  { %2433 = vmatpush3.bf16.msra.mxu1 %v3056_v36  ;;  %2403 = vmatprep.subr.bf16.mxu0 %v3058_v37  ;;  %3327 = vst [vmem:[#allocation18_spill] sm:$0xff] %v3099_v28  ;;  %v3104_v44 = vpack.c.bf16 %v180_v38, %v179_v35  ;;  %v197_v59 = vld [vmem:[#allocation7 + $0x1f0] sm:$0xff]  ;;  %v3109_v60 = vpack.c.bf16 %v166_v51, %v165_v50  ;;  %v198_v5 = vld [vmem:[#allocation7 + $0x1f8] sm:$0xff]  ;;  %v3331_v50 = vmov 0.0|0.0   ;;  %v2740_v51 = vmov 1935823168  }
 0x491   :  { %2435 = vmatprep.subr.bf16.mxu1 %v3061_v46  ;;  %v149_v11 = vld [vmem:[#allocation7 + $0x70] sm:$0xff]  ;;  %v150_v12 = vld [vmem:[#allocation7 + $0x78] sm:$0xff]  ;;  %v3111_v27 = vpack.c.bf16 %v198_v5, %v197_v59  ;;  %v891_v59 = vunpack.c.l.s4 %v2740_v51 }
 0x492   :  { %3328 = vst [vmem:[#allocation19_spill] sm:$0xff] %v3104_v44  ;;  %v3113_v30 = vpack.c.bf16 %v150_v12, %v149_v11  ;;  %v181_v35 = vld [vmem:[#allocation7 + $0x170] sm:$0xff]  ;;  %v182_v38 = vld [vmem:[#allocation7 + $0x178] sm:$0xff] }
 0x493   :  { %2405 = vmatpush3.bf16.msra.mxu0 %v3064_v52  ;;  %3329 = vst [vmem:[#allocation20_spill] sm:$0xff] %v3111_v27  ;;  %v3116_v43 = vpack.c.bf16 %v182_v38, %v181_v35  ;;  %v892_v5 = vunpack.c.0.s8 %v891_v59 }
 0x494   :  { %2437 = vmatpush3.bf16.msra.mxu1 %v3068_v2  ;;  %2407 = vmatprep.subr.bf16.mxu0 %v3070_v3 }
 0x495   :  { %2439 = vmatprep.subr.bf16.mxu1 %v3073_v8  ;;  %3330 = vst [vmem:[#allocation21_spill] sm:$0xff] %v3116_v43  ;;  %v3124_v11 = vsub.s32 %v892_v5, %v2984_v56 }
 0x497   :  { %2409 = vmatpush3.bf16.msra.mxu0 %v3076_v16 }
 0x498   :  { %2441 = vmatpush3.bf16.msra.mxu1 %v3080_v21  ;;  %2411 = vmatprep.subr.bf16.mxu0 %v3085_v34 }
 0x499   :  { %2443 = vmatprep.subr.bf16.mxu1 %v3087_v45 }
 0x49b   :  { %2413 = vmatpush3.bf16.msra.mxu0 %v3089_v49 }
 0x49c   :  { %2445 = vmatpush3.bf16.msra.mxu1 %v3092_v54  ;;  %2415 = vmatprep.subr.bf16.mxu0 %v3097_v6 }
 0x49d   :  { %2447 = vmatprep.subr.bf16.mxu1 %v3099_v28 }
 0x49f   :  { %2417 = vmatpush3.bf16.msra.mxu0 %v3101_v31 }
 0x4a0   :  { %2449 = vmatpush3.bf16.msra.mxu1 %v3104_v44  ;;  %2419 = vmatprep.subr.bf16.mxu0 %v3109_v60 }
 0x4a1   :  { %2451 = vmatprep.subr.bf16.mxu1 %v3111_v27 }
 0x4a3   :  { %2421 = vmatpush3.bf16.msra.mxu0 %v3113_v30 }
 0x4a4   :  { %2453 = vmatpush3.bf16.msra.mxu1 %v3116_v43  ;;  %2454 = vmatprep.subr.bf16.mxu0 %v3331_v50 }
 0x4a5   :  { %2478 = vmatprep.subr.bf16.mxu1 %v3331_v50 }
 0x55a   :  { %v2188_v12 = vpop.f32.mrb[4].mxu1 }
 0x55b   :  { %v903_v35 = vrot.slane %v2188_v12, %v3124_v11  ;;  %v871_v38 = vpop.f32.mrb[5].mxu1 }
 0x55c   :  { %v896_v27 = vrot.slane %v871_v38, %v3124_v11 }
 0x55e   :  { %v922_v44 = vcombine.low %v896_v27, %v903_v35  ;;  %v923_v28 = vcombine.high %v896_v27, %v903_v35  ;;  %v2191_v54 = vpop.f32.mrb[6].mxu1 }
 0x55f   :  { %v917_v43 = vrot.slane %v2191_v54, %v3124_v11  ;;  %v881_v45 = vpop.f32.mrb[7].mxu1 }
 0x560   :  { %v910_v21 = vrot.slane %v881_v45, %v3124_v11  ;;  %v932_v59 = vrot.slane %v922_v44, %v2987_v58  ;;  %v939_v56 = vrot.slane %v923_v28, %v2987_v58  ;;  %v2741_v44 = vmov 0  }
 0x561   :  { %2581 = vset.pattern.permute.xlu0 %v2741_v44  ;;  %2582 = vset.pattern.permute.xlu1 %v2741_v44 }
 0x562   :  { %v924_v8 = vcombine.low %v910_v21, %v917_v43  ;;  %v925_v51 = vcombine.high %v910_v21, %v917_v43  ;;  %v1201_v43 = vpop.xlane.xlu1 %1200 }
 0x563   :  { %v1202_v21 = vmul.f32 0.0078125, %v1201_v43 }
 0x564   :  { %v946_v5 = vrot.slane %v924_v8, %v2987_v58  ;;  %v953_v12 = vrot.slane %v925_v51, %v2987_v58  ;;  %v3332_v8 = vmov 0.0  }
 0x566   :  { %v954_v2 = vcombine.low %v932_v59, %v946_v5  ;;  %v956_v38 = vcombine.low %v939_v56, %v953_v12  ;;  %v955_v46 = vcombine.high %v932_v59, %v946_v5  ;;  %v957_v27 = vcombine.high %v939_v56, %v953_v12 }
 0x568   :  { %1026 = vmatprep.mubr.f32.mxu0 %v955_v46  ;;  %1096 = vmatprep.mubr.f32.mxu1 %v957_v27 }
 0x569   :  { %1027 = vmatmul.mubr.f32.vlgmr.msra.gmra.mrb[8].mxu0 %v954_v2  ;;  %1097 = vmatmul.mubr.f32.vlgmr.msra.gmra.mrb[8].mxu1 %v956_v38 }
 0x56a   :  { %2456 = vmatpush3.bf16.msra.mxu0 %v2911_v55  ;;  %2480 = vmatpush3.bf16.msra.mxu1 %v2913_v57  ;;  %v1203_v55 = vadd.f32 1e-05, %v1202_v21 }
 0x56b   :  { %2457 = vmatprep.subr.bf16.mxu0 %v3331_v50  ;;  %2481 = vmatprep.subr.bf16.mxu1 %v3331_v50 }
 0x56c   :  { %2224 = vmatprep.mubr.msk.f32.mxu0 %vm2737_vm0, %v3332_v8  ;;  %2259 = vmatprep.mubr.msk.f32.mxu1 %vm2737_vm0, %v3332_v8  ;;  %2603 = vrsqrt.f32 %v1203_v55 }
 0x56e   :  { %2459 = vmatpush3.bf16.msra.mxu0 %v2917_v63  ;;  %2483 = vmatpush3.bf16.msra.mxu1 %v2919_v0 }
 0x56f   :  { %2460 = vmatprep.subr.bf16.mxu0 %v3331_v50  ;;  %2484 = vmatprep.subr.bf16.mxu1 %v3331_v50 }
 0x572   :  { %2462 = vmatpush3.bf16.msra.mxu0 %v2929_v1  ;;  %2486 = vmatpush3.bf16.msra.mxu1 %v2931_v7 }
 0x573   :  { %2463 = vmatprep.subr.bf16.mxu0 %v3331_v50  ;;  %2487 = vmatprep.subr.bf16.mxu1 %v3331_v50 }
 0x576   :  { %2465 = vmatpush3.bf16.msra.mxu0 %v2937_v13  ;;  %2489 = vmatpush3.bf16.msra.mxu1 %v2939_v14  ;;  %v2604_v57 = vpop.eup %2603 }
 0x577   :  { %2466 = vmatprep.subr.bf16.mxu0 %v3331_v50  ;;  %2490 = vmatprep.subr.bf16.mxu1 %v3331_v50  ;;  %v1205_v63 = vmul.f32 %v2604_v57, %v3017_v18 }
 0x579   :  { %v1206_v0 = vmul.f32 %v2979_v42, %v1205_v63 }
 0x57a   :  { %2468 = vmatpush3.bf16.msra.mxu0 %v2945_v19  ;;  %2492 = vmatpush3.bf16.msra.mxu1 %v2947_v20 }
 0x57b   :  { %2469 = vmatprep.subr.bf16.mxu0 %v3331_v50  ;;  %2493 = vmatprep.subr.bf16.mxu1 %v3331_v50 }
 0x57e   :  { %2471 = vmatpush3.bf16.msra.mxu0 %v2953_v25  ;;  %2495 = vmatpush3.bf16.msra.mxu1 %v2955_v26 }
 0x57f   :  { %2472 = vmatprep.subr.bf16.mxu0 %v3331_v50  ;;  %2496 = vmatprep.subr.bf16.mxu1 %v3331_v50 }
 0x582   :  { %2474 = vmatpush3.bf16.msra.mxu0 %v2961_v32  ;;  %2498 = vmatpush3.bf16.msra.mxu1 %v2963_v33 }
 0x583   :  { %2475 = vmatprep.subr.bf16.mxu0 %v3331_v50  ;;  %2499 = vmatprep.subr.bf16.mxu1 %v3331_v50 }
 0x586   :  { %2477 = vmatpush3.bf16.msra.mxu0 %v2969_v39  ;;  %2501 = vmatpush3.bf16.msra.mxu1 %v2971_v40 }
 0x589   :  { %2225 = vmatmul.mubr.f32.vlgmr.msra.gmra.mrb[10].mxu0 %v1206_v0  ;;  %2260 = vmatmul.mubr.f32.vlgmr.msra.gmra.mrb[10].mxu1 %v1206_v0  ;;  %v3333_v0 = vld [vmem:[#allocation12_spill] sm:$0xff] }
 0x58a   :  { %2264 = vmatprep.mubr.f32.mxu0 %v2994_v15 }
 0x63c   :  { %v1954_v1 = vpop.f32.mrb[8].mxu0  ;;  %v1989_v7 = vpop.f32.mrb[8].mxu1 }
 0x63d   :  { %v1955_v13 = vpop.f32.mrb[9].mxu0  ;;  %v1990_v14 = vpop.f32.mrb[9].mxu1 }
 0x63e   :  { %v1956_v19 = vadd.f32 %v1955_v13, %v1954_v1  ;;  %v1991_v20 = vadd.f32 %v1990_v14, %v1989_v7  ;;  %v1121_v1 = vld [vmem:[%s3290_s1 + $0x8] sm:$0x1]  ;;  %v3335_v7 = vld [vmem:[#allocation14_spill] sm:$0xff]  ;;  %v3337_v13 = vld [vmem:[#allocation16_spill] sm:$0xff] }
 0x63f   :  { %vm1123_vm2 = vcmp.eq.s32.totalorder %v1121_v1, 0  ;;  %v3340_v14 = vld [vmem:[#allocation19_spill] sm:$0xff] }
 0x640   :  { %v3171_v25 = vadd.f32 %v1991_v20, %v1956_v19  ;;  %v3341_v19 = vld [vmem:[#allocation20_spill] sm:$0xff]  ;;  %v3342_v20 = vld [vmem:[#allocation21_spill] sm:$0xff] }
 0x65c   :  { %v1273_v26 = vpop.f32.mrb[10].mxu0  ;;  %v1343_v32 = vpop.f32.mrb[10].mxu1 }
 0x65d   :  { %v2226_v33 = vpop.f32.mrb[11].mxu0  ;;  %v2261_v39 = vpop.f32.mrb[11].mxu1  ;;  %2262 = vmatprep.subr.mxu0 %v1273_v26  ;;  %2270 = vmatprep.subr.mxu1 %v1343_v32 }
 0x65e   :  { %2263 = vmatpush3.xpose.msra.mxu0 %v1273_v26  ;;  %2271 = vmatpush3.msra.mxu1 %v1343_v32 }
 0x65f   :  { %2503 = vmatprep.subr.bf16.mxu0 %v3025_v41  ;;  %2535 = vmatprep.subr.bf16.mxu1 %v3027_v47 }
 0x661   :  { %2265 = vmatmul.mubr.f32.vlgmr.msra.gmra.mrb[12].mxu0 %v2997_v22 }
 0x662   :  { %2267 = vmatprep.mubr.f32.mxu0 %v2999_v23  ;;  %2505 = vmatpush3.bf16.msra.mxu0 %v3029_v48 }
 0x663   :  { %2507 = vmatprep.subr.bf16.mxu0 %v3036_v61 }
 0x665   :  { %2268 = vmatmul.mubr.f32.gmra.mrb[14].mxu0 %v3003_v24 }
 0x666   :  { %2509 = vmatpush3.bf16.msra.mxu0 %v3041_v4 }
 0x667   :  { %2511 = vmatprep.subr.bf16.mxu0 %v3047_v10 }
 0x66a   :  { %2513 = vmatpush3.bf16.msra.mxu0 %v3052_v29 }
 0x66b   :  { %2515 = vmatprep.subr.bf16.mxu0 %v3058_v37 }
 0x66e   :  { %2517 = vmatpush3.bf16.msra.mxu0 %v3064_v52 }
 0x66f   :  { %2519 = vmatprep.subr.bf16.mxu0 %v3070_v3 }
 0x672   :  { %2521 = vmatpush3.bf16.msra.mxu0 %v3076_v16 }
 0x673   :  { %2523 = vmatprep.subr.bf16.mxu0 %v3085_v34 }
 0x676   :  { %2525 = vmatpush3.bf16.msra.mxu0 %v3089_v49 }
 0x677   :  { %2527 = vmatprep.subr.bf16.mxu0 %v3097_v6 }
 0x67a   :  { %2529 = vmatpush3.bf16.msra.mxu0 %v3101_v31 }
 0x67b   :  { %2531 = vmatprep.subr.bf16.mxu0 %v3109_v60 }
 0x67e   :  { %2533 = vmatpush3.bf16.msra.mxu0 %v3113_v30 }
 0x734   :  { %v2266_v40 = vpop.f32.mrb[12].mxu0 }
 0x735   :  { %v1413_v42 = vpop.f32.mrb[13].mxu0  ;;  %v1435_v15 = vsel %vm748_vm1, %v2266_v40, -inf }
 0x736   :  { %1436 = vmax.xlane.f32.xlu1 %v1435_v15  ;;  %v1432_v22 = vsel %vm748_vm1, %v1413_v42, -inf }
 0x737   :  { %1433 = vmax.xlane.f32.xlu0 %v1432_v22 }
 0x738   :  { %v2269_v23 = vpop.f32.mrb[14].mxu0 }
 0x739   :  { %v1423_v24 = vpop.f32.mrb[15].mxu0  ;;  %v1441_v18 = vsel %vm748_vm1, %v2269_v23, -inf }
 0x73a   :  { %1442 = vmax.xlane.f32.xlu1 %v1441_v18  ;;  %v1438_v41 = vsel %vm748_vm1, %v1423_v24, -inf }
 0x73b   :  { %1439 = vmax.xlane.f32.xlu0 %v1438_v41 }
 0x7c3   :  { %v1437_v47 = vpop.xlane.xlu1 %1436 }
 0x7c4   :  { %v1445_v48 = vsub.f32 %v2266_v40, %v1437_v47  ;;  %v1434_v61 = vpop.xlane.xlu0 %1433 }
 0x7c5   :  { %v1444_v30 = vsub.f32 %v1413_v42, %v1434_v61 }
 0x7c6   :  { %v1450_v4 = vmul.f32 1.442695, %v1445_v48 }
 0x7c7   :  { %v1448_v10 = vmul.f32 1.442695, %v1444_v30  ;;  %v1443_v29 = vpop.xlane.xlu1 %1442 }
 0x7c8   :  { %2605 = vpow2.f32 %v1450_v4  ;;  %v1447_v37 = vsub.f32 %v2269_v23, %v1443_v29  ;;  %v1440_v46 = vpop.xlane.xlu0 %1439 }
 0x7c9   :  { %2607 = vpow2.f32 %v1448_v10  ;;  %v1446_v52 = vsub.f32 %v1423_v24, %v1440_v46 }
 0x7ca   :  { %v1454_v2 = vmul.f32 1.442695, %v1447_v37 }
 0x7cb   :  { %v1452_v3 = vmul.f32 1.442695, %v1446_v52 }
 0x7cc   :  { %2609 = vpow2.f32 %v1454_v2 }
 0x7cd   :  { %2611 = vpow2.f32 %v1452_v3 }
 0x7d2   :  { %v2606_v16 = vpop.eup %2605 }
 0x7d3   :  { %v2608_v34 = vpop.eup %2607  ;;  %v1459_v45 = vsel %vm748_vm1, %v2606_v16, 0.0 }
 0x7d4   :  { %1460 = vadd.xlane.f32.xlu1 %v1459_v45  ;;  %v1456_v49 = vsel %vm748_vm1, %v2608_v34, 0.0 }
 0x7d5   :  { %1457 = vadd.xlane.f32.xlu0 %v1456_v49 }
 0x7d6   :  { %v2610_v54 = vpop.eup %2609 }
 0x7d7   :  { %v2612_v6 = vpop.eup %2611  ;;  %v1465_v28 = vsel %vm748_vm1, %v2610_v54, 0.0 }
 0x7d8   :  { %1466 = vadd.xlane.f32.xlu1 %v1465_v28  ;;  %v1462_v31 = vsel %vm748_vm1, %v2612_v6, 0.0 }
 0x7d9   :  { %1463 = vadd.xlane.f32.xlu0 %v1462_v31 }
 0x7dd   :  { %1102 = vadd.xlane.f32.xlu0 %v3171_v25 }
 0x861   :  { %v1461_v60 = vpop.xlane.xlu1 %1460 }
 0x862   :  { %2613 = vrcp.f32 %v1461_v60  ;;  %v1458_v50 = vpop.xlane.xlu0 %1457  ;;  %v1874_v60 = vld [vmem:[%s3290_s1 + $0x10] sm:$0xff] }
 0x863   :  { %2615 = vrcp.f32 %v1458_v50  ;;  %vm1800_vm5 = vcmp.eq.s32.totalorder %v1874_v60, 0 }
 0x865   :  { %v1467_v35 = vpop.xlane.xlu1 %1466 }
 0x866   :  { %2617 = vrcp.f32 %v1467_v35  ;;  %v1464_v51 = vpop.xlane.xlu0 %1463  ;;  %v1802_v35 = vsel %vm1800_vm5, 1, %v2741_v44 }
 0x867   :  { %2619 = vrcp.f32 %v1464_v51 }
 0x86a   :  { %v1103_v59 = vpop.xlane.xlu0 %1102 }
 0x86b   :  { %v1104_v56 = vmul.f32 0.0078125, %v1103_v59 }
 0x86c   :  { %v2614_v5 = vpop.eup %2613 }
 0x86d   :  { %v2616_v12 = vpop.eup %2615  ;;  %v3205_v38 = vsub.f32 %v3171_v25, %v1104_v56  ;;  %v1471_v43 = vmul.f32 %v2614_v5, %v2606_v16 }
 0x86e   :  { %v1469_v27 = vmul.f32 %v2616_v12, %v2608_v34  ;;  %v1120_v34 = vld [vmem:[%s3290_s1] sm:$0xff] }
 0x86f   :  { %v1106_v8 = vmul.f32 %v3205_v38, %v3205_v38  ;;  %vm1122_vm4 = vcmp.eq.s32.totalorder %v1120_v34, 0  ;;  %v1864_v12 = vld [vmem:[%s3298_s9] ss:$0 sm:$0xff] }
 0x870   :  { %v2618_v21 = vpop.eup %2617  ;;  %2272 = vmatprep.mubr.msk.f32.mxu1 %vm748_vm1, %v1469_v27  ;;  %v1124_v49 = vsel %vm1122_vm4, 1, %v2741_v44 }
 0x871   :  { %v2620_v55 = vpop.eup %2619  ;;  %2273 = vmatmul.mubr.msk.f32.vlgmr.msra.gmra.mrb[12].mxu1 %vm748_vm1, %v1471_v43  ;;  %1107 = vadd.xlane.f32.xlu0 %v1106_v8  ;;  %v1475_v63 = vmul.f32 %v2618_v21, %v2610_v54  ;;  %v1865_v21 = vld [vmem:[%s3299_s10] ss:$0 sm:$0xff] }
 0x872   :  { %v1473_v57 = vmul.f32 %v2620_v55, %v2612_v6  ;;  %2537 = vmatpush3.bf16.msra.mxu1 %v3032_v53  ;;  %v3334_v53 = vld [vmem:[#allocation13_spill] sm:$0xff] }
 0x873   :  { %2539 = vmatprep.subr.bf16.mxu1 %v3038_v62  ;;  %v3336_v62 = vld [vmem:[#allocation15_spill] sm:$0xff] }
 0x874   :  { %2275 = vmatprep.mubr.msk.f32.mxu1 %vm748_vm1, %v1473_v57 }
 0x875   :  { %2276 = vmatmul.mubr.msk.f32.gmra.mrb[14].mxu1 %vm748_vm1, %v1475_v63 }
 0x876   :  { %2541 = vmatpush3.bf16.msra.mxu1 %v3045_v9  ;;  %v1125_v9 = vsel %vm1123_vm2, 1, %v2741_v44 }
 0x877   :  { %2543 = vmatprep.subr.bf16.mxu1 %v3049_v17  ;;  %v3338_v17 = vld [vmem:[#allocation17_spill] sm:$0xff] }
 0x87a   :  { %2545 = vmatpush3.bf16.msra.mxu1 %v3056_v36  ;;  %v3339_v36 = vld [vmem:[#allocation18_spill] sm:$0xff] }
 0x87b   :  { %2547 = vmatprep.subr.bf16.mxu1 %v3333_v0  ;;  %v200_v0 = vld [vmem:[%s3300_s11] sm:$0x1] }
 0x87e   :  { %2549 = vmatpush3.bf16.msra.mxu1 %v3334_v53 }
 0x87f   :  { %2551 = vmatprep.subr.bf16.mxu1 %v3335_v7 }
 0x882   :  { %2553 = vmatpush3.bf16.msra.mxu1 %v3336_v62 }
 0x883   :  { %2555 = vmatprep.subr.bf16.mxu1 %v3337_v13 }
 0x886   :  { %2557 = vmatpush3.bf16.msra.mxu1 %v3338_v17 }
 0x887   :  { %1130 = vperm.xlu0 %2581, %v1125_v9   ;;  %2559 = vmatprep.subr.bf16.mxu1 %v3339_v36 }
 0x88a   :  { %2561 = vmatpush3.bf16.msra.mxu1 %v3340_v14 }
 0x88b   :  { %2563 = vmatprep.subr.bf16.mxu1 %v3341_v19 }
 0x88e   :  { %2565 = vmatpush3.bf16.msra.mxu1 %v3342_v20 }
 0x8fe   :  { %v1108_v50 = vpop.xlane.xlu0 %1107 }
 0x8ff   :  { %v1109_v51 = vmul.f32 0.0078125, %v1108_v50 }
 0x901   :  { %v1110_v59 = vadd.f32 1e-05, %v1109_v51 }
 0x903   :  { %2621 = vrsqrt.f32 %v1110_v59 }
 0x906   :  { %v1131_v27 = vpop.permute.xlu0 %1130 }
 0x907   :  { %vm1133_vm6 = vcmp.eq.s32.totalorder %v1131_v27, 1 }
 0x90d   :  { %v2622_v56 = vpop.eup %2621 }
 0x90e   :  { %v1112_v5 = vmul.f32 %v2622_v56, %v3205_v38 }
 0x910   :  { %v1119_v8 = vmul.f32 %v1864_v12, %v1112_v5 }
 0x912   :  { %v1145_v55 = vrot.slane %v1119_v8, 7 }
 0x914   :  { %v1148_v7 = vsel %vm1147_vm8, %v200_v0, %v1145_v55 }
 0x944   :  { %v2274_v25 = vpop.f32.mrb[12].mxu1 }
 0x945   :  { %v1586_v26 = vrot.slane %v2274_v25, %v3124_v11  ;;  %v1554_v32 = vpop.f32.mrb[13].mxu1 }
 0x946   :  { %v1579_v33 = vrot.slane %v1554_v32, %v3124_v11 }
 0x948   :  { %v1605_v39 = vcombine.low %v1579_v33, %v1586_v26  ;;  %v1606_v40 = vcombine.high %v1579_v33, %v1586_v26  ;;  %v2277_v42 = vpop.f32.mrb[14].mxu1 }
 0x949   :  { %v1600_v15 = vrot.slane %v2277_v42, %v3124_v11  ;;  %v1564_v22 = vpop.f32.mrb[15].mxu1 }
 0x94a   :  { %v1593_v23 = vrot.slane %v1564_v22, %v3124_v11  ;;  %v1615_v41 = vrot.slane %v1605_v39, %v2987_v58  ;;  %v1622_v47 = vrot.slane %v1606_v40, %v2987_v58 }
 0x94c   :  { %v1607_v24 = vcombine.low %v1593_v23, %v1600_v15  ;;  %v1608_v18 = vcombine.high %v1593_v23, %v1600_v15 }
 0x94e   :  { %v1629_v48 = vrot.slane %v1607_v24, %v2987_v58  ;;  %v1636_v61 = vrot.slane %v1608_v18, %v2987_v58  ;;  %v1875_v58 = vld [vmem:[%s3290_s1 + $0x18] sm:$0x1] }
 0x94f   :  { %vm1801_vm3 = vcmp.eq.s32.totalorder %v1875_v58, 0 }
 0x950   :  { %v1637_v30 = vcombine.low %v1615_v41, %v1629_v48  ;;  %v1639_v4 = vcombine.low %v1622_v47, %v1636_v61  ;;  %v1638_v10 = vcombine.high %v1615_v41, %v1629_v48  ;;  %v1640_v29 = vcombine.high %v1622_v47, %v1636_v61 }
 0x951   :  { %v1803_v45 = vsel %vm1801_vm3, 1, %v2741_v44  ;;  %v1866_v44 = vld [vmem:[%s3299_s10 + $0x1] ss:$0 sm:$0xff] }
 0x952   :  { %1709 = vmatprep.mubr.f32.mxu0 %v1638_v10  ;;  %1779 = vmatprep.mubr.f32.mxu1 %v1640_v29  ;;  %v1143_v57 = vsel %vm1133_vm6, %v1865_v21, %v1866_v44 }
 0x953   :  { %1710 = vmatmul.mubr.f32.vlgmr.msra.gmra.mrb[16].mxu0 %v1637_v30  ;;  %1780 = vmatmul.mubr.f32.vlgmr.msra.gmra.mrb[16].mxu1 %v1639_v4  ;;  %v1150_v38 = vadd.f32 %v1145_v55, %v1143_v57 }
 0x955   :  { %v1153_v1 = vsel %vm1147_vm8, %v1150_v38, 0.0 }
 0xa26   :  { %v2068_v37 = vpop.f32.mrb[16].mxu0  ;;  %v2103_v11 = vpop.f32.mrb[16].mxu1 }
 0xa27   :  { %v2069_v46 = vpop.f32.mrb[17].mxu0  ;;  %v2104_v52 = vpop.f32.mrb[17].mxu1 }
 0xa28   :  { %v2070_v2 = vadd.f32 %v2069_v46, %v2068_v37  ;;  %v2105_v3 = vadd.f32 %v2104_v52, %v2103_v11 }
 0xa2a   :  { %v1782_v16 = vadd.f32 %v2105_v3, %v2070_v2 }
 0xa2c   :  { %1785 = vadd.xlane.f32.xlu1 %v1782_v16 }
 0xa3d   :  { %1808 = vperm.xlu1 %2582, %v1803_v45  }
 0xa41   :  { %1127 = vperm.xlu1 %2582, %v1124_v49  }
 0xab9   :  { %v1786_v54 = vpop.xlane.xlu1 %1785 }
 0xaba   :  { %v1787_v6 = vmul.f32 0.0078125, %v1786_v54 }
 0xabc   :  { %v1788_v28 = vsub.f32 %v1782_v16, %v1787_v6  ;;  %v1867_v6 = vld [vmem:[%s3301_s12] ss:$0 sm:$0xff] }
 0xabd   :  { %v1809_v43 = vpop.permute.xlu1 %1808 }
 0xabe   :  { %v1789_v31 = vmul.f32 %v1788_v28, %v1788_v28  ;;  %vm1811_vm9 = vcmp.eq.s32.totalorder %v1809_v43, 1 }
 0xabf   :  { %v1813_v26 = vsel %vm1811_vm9, %v1865_v21, %v1866_v44 }
 0xac0   :  { %1790 = vadd.xlane.f32.xlu1 %v1789_v31  ;;  %v1868_v31 = vld [vmem:[%s3302_s13] ss:$0 sm:$0xff] }
 0xac1   :  { %v1128_v63 = vpop.permute.xlu1 %1127 }
 0xac2   :  { %vm1132_vm7 = vcmp.eq.s32.totalorder %v1128_v63, 1 }
 0xac3   :  { %v1142_v53 = vsel %vm1132_vm7, %v1865_v21, %v1866_v44 }
 0xac4   :  { %v1149_v62 = vadd.f32 %v1148_v7, %v1142_v53 }
 0xad1   :  { %1805 = vperm.xlu1 %2582, %v1802_v35  }
 0xaf5   :  { %1154 = vadd.xlane.f32.xlu1 %v1153_v1 }
 0xaf9   :  { %1151 = vadd.xlane.f32.xlu1 %v1149_v62 }
 0xb4d   :  { %v1791_v13 = vpop.xlane.xlu1 %1790 }
 0xb4e   :  { %v1792_v9 = vmul.f32 0.0078125, %v1791_v13 }
 0xb50   :  { %v1793_v17 = vadd.f32 1e-05, %v1792_v9 }
 0xb51   :  { %v1806_v14 = vpop.permute.xlu1 %1805 }
 0xb52   :  { %2623 = vrsqrt.f32 %v1793_v17  ;;  %vm1810_vm10 = vcmp.eq.s32.totalorder %v1806_v14, 1 }
 0xb53   :  { %v1812_v33 = vsel %vm1810_vm10, %v1865_v21, %v1866_v44 }
 0xb5c   :  { %v2624_v36 = vpop.eup %2623 }
 0xb5d   :  { %v1795_v19 = vmul.f32 %v2624_v36, %v1788_v28 }
 0xb5f   :  { %v1796_v20 = vmul.f32 %v1864_v12, %v1795_v19 }
 0xb61   :  { %v1815_v25 = vrot.slane %v1796_v20, 7 }
 0xb63   :  { %v1819_v32 = vadd.f32 %v1815_v25, %v1813_v26  ;;  %v1817_v39 = vsel %vm1147_vm8, %v200_v0, %v1815_v25 }
 0xb64   :  { %v1818_v40 = vadd.f32 %v1817_v39, %v1812_v33 }
 0xb65   :  { %v1822_v42 = vsel %vm1147_vm8, %v1819_v32, 0.0 }
 0xb66   :  { %1823 = vadd.xlane.f32.xlu0 %v1822_v42  ;;  %1820 = vadd.xlane.f32.xlu1 %v1818_v40 }
 0xb82   :  { %v1155_v15 = vpop.xlane.xlu1 %1154 }
 0xb83   :  { %v1157_v22 = vmul.f32 0.0078125, %v1155_v15 }
 0xb85   :  { %v1159_v18 = vsub.f32 %v1150_v38, %v1157_v22 }
 0xb86   :  { %v1152_v23 = vpop.xlane.xlu1 %1151 }
 0xb87   :  { %v1156_v24 = vmul.f32 0.0078125, %v1152_v23  ;;  %v1161_v48 = vmul.f32 %v1159_v18, %v1159_v18 }
 0xb89   :  { %v1158_v41 = vsub.f32 %v1149_v62, %v1156_v24  ;;  %v1164_v61 = vsel %vm1147_vm8, %v1161_v48, 0.0 }
 0xb8b   :  { %v1160_v47 = vmul.f32 %v1158_v41, %v1158_v41 }
 0xb8d   :  { %1162 = vadd.xlane.f32.xlu1 %v1160_v47 }
 0xb91   :  { %1165 = vadd.xlane.f32.xlu1 %v1164_v61 }
 0xbf3   :  { %v1821_v30 = vpop.xlane.xlu1 %1820  ;;  %v1824_v4 = vpop.xlane.xlu0 %1823 }
 0xbf4   :  { %v1825_v10 = vmul.f32 0.0078125, %v1821_v30  ;;  %v1826_v29 = vmul.f32 0.0078125, %v1824_v4 }
 0xbf6   :  { %v1827_v37 = vsub.f32 %v1818_v40, %v1825_v10  ;;  %v1828_v11 = vsub.f32 %v1819_v32, %v1826_v29 }
 0xbf8   :  { %v1829_v46 = vmul.f32 %v1827_v37, %v1827_v37  ;;  %v1830_v52 = vmul.f32 %v1828_v11, %v1828_v11 }
 0xbfa   :  { %1831 = vadd.xlane.f32.xlu0 %v1829_v46  ;;  %v1833_v2 = vsel %vm1147_vm8, %v1830_v52, 0.0 }
 0xbfb   :  { %1834 = vadd.xlane.f32.xlu1 %v1833_v2 }
 0xc1a   :  { %v1163_v3 = vpop.xlane.xlu1 %1162 }
 0xc1b   :  { %v1167_v16 = vmul.f32 0.0078125, %v1163_v3 }
 0xc1d   :  { %v1169_v58 = vadd.f32 1e-12, %v1167_v16 }
 0xc1e   :  { %v1166_v34 = vpop.xlane.xlu1 %1165 }
 0xc1f   :  { %2625 = vrsqrt.f32 %v1169_v58  ;;  %v1168_v45 = vmul.f32 0.0078125, %v1166_v34 }
 0xc21   :  { %v1170_v49 = vadd.f32 1e-12, %v1168_v45 }
 0xc23   :  { %2627 = vrsqrt.f32 %v1170_v49 }
 0xc29   :  { %v2626_v54 = vpop.eup %2625 }
 0xc2a   :  { %v1173_v28 = vmul.f32 %v2626_v54, %v1158_v41 }
 0xc2c   :  { %v1181_v60 = vmul.f32 %v1867_v6, %v1173_v28 }
 0xc2d   :  { %v2628_v50 = vpop.eup %2627 }
 0xc2e   :  { %v1189_v35 = vadd.f32 %v1868_v31, %v1181_v60  ;;  %v1174_v51 = vmul.f32 %v2628_v50, %v1159_v18 }
 0xc30   :  { %1191 = vst [vmem:[%s3303_s14] sm:$0xff] %v1189_v35  ;;  %v1182_v59 = vmul.f32 %v1867_v6, %v1174_v51 }
 0xc32   :  { %v1190_v56 = vadd.f32 %v1868_v31, %v1182_v59 }
 0xc34   :  { %1192 = vst [vmem:[%s3303_s14 + $0x8] sm:$0x1] %v1190_v56 }
 0xc87   :  { %v1832_v5 = vpop.xlane.xlu0 %1831 }
 0xc88   :  { %v1836_v12 = vmul.f32 0.0078125, %v1832_v5  ;;  %v1835_v27 = vpop.xlane.xlu1 %1834 }
 0xc89   :  { %v1837_v43 = vmul.f32 0.0078125, %v1835_v27 }
 0xc8a   :  { %v1838_v8 = vadd.f32 1e-12, %v1836_v12 }
 0xc8b   :  { %v1839_v21 = vadd.f32 1e-12, %v1837_v43 }
 0xc8c   :  { %2629 = vrsqrt.f32 %v1838_v8 }
 0xc8d   :  { %2631 = vrsqrt.f32 %v1839_v21 }
 0xc96   :  { %v2630_v44 = vpop.eup %2629 }
 0xc97   :  { %v2632_v55 = vpop.eup %2631  ;;  %v1842_v57 = vmul.f32 %v2630_v44, %v1827_v37 }
 0xc98   :  { %v1843_v63 = vmul.f32 %v2632_v55, %v1828_v11 }
 0xc99   :  { %v1844_v38 = vmul.f32 %v1867_v6, %v1842_v57 }
 0xc9a   :  { %v1845_v0 = vmul.f32 %v1867_v6, %v1843_v63 }
 0xc9b   :  { %v1846_v1 = vadd.f32 %v1868_v31, %v1844_v38 }
 0xc9c   :  { %v1847_v53 = vadd.f32 %v1868_v31, %v1845_v0 }
 0xc9d   :  { %1876 = vst [vmem:[%s3303_s14 + $0x10] sm:$0xff] %v1846_v1 }
 0xc9e   :  { %1877 = vst [vmem:[%s3303_s14 + $0x18] sm:$0x1] %v1847_v53 }
 0xc9f   :  { %1855 = vsyncpa [#allocation3], 1 }
 0xca0   :  { %1856 = vsyncpa [#allocation5], 1 }
 0xca1   :  { %1857 = vsyncpa [#allocation8], 1 }

</bundles_post_ra>
